<compile_context>
chip_gen: v7x
topology: tpu7x:2x2x1
jax: 0.10.0
libtpu: 0.0.40
codegen_flags: <defaults>
</compile_context>

<pallas_src>
import functools

import numpy as np
import jax
import jax.numpy as jnp
from jax import lax
from jax.experimental import pallas as pl
from jax.experimental.pallas import tpu as pltpu


def _round_up(x, m):
    return ((x + m - 1) // m) * m


def _dn4_kernel(q_ref, s_ref, o_ref, qn_ref, tk_ref, *, n_way, m_q_pad,
                m_s_pad, m_s, tile_nq, neighbor_k, chunk_rows):
    # q_ref : [1, rows, c] f32          (rows = tile_nq * m_q_pad)
    # s_ref : [1, n_way, c, m_s_pad] bf16, already cosine-normalized + padded
    # o_ref : [1, 1, tile_nq, n_way] f32
    # qn_ref: [rows, c] bf16 scratch    tk_ref: [rows, n_way] f32 scratch
    rows = tile_nq * m_q_pad
    n_chunks = rows // chunk_rows

    # --- query cosine normalization (once per grid step), stage as bf16 ---
    # matches F.normalize(eps=1e-12): x * rsqrt(max(ssq, eps^2))
    qf = q_ref[0].astype(jnp.float32)                              # (rows, c)
    qn = qf * lax.rsqrt(jnp.maximum(jnp.sum(qf * qf, axis=-1, keepdims=True),
                                    1e-24))
    qn_ref[...] = qn.astype(jnp.bfloat16)

    # broadcastable lane-index row + additive pad bias, hoisted out of all loops
    lane = lax.broadcasted_iota(jnp.int32, (1, m_s_pad), 1)        # (1, m_s_pad)
    pad_bias = None
    if m_s_pad != m_s:
        # zero-padded support descriptors must never enter the top-k
        pad_bias = jnp.where(lane < m_s, 0.0, -1e30).astype(jnp.float32)
    inv_k = jnp.float32(1.0 / neighbor_k)

    for w in range(n_way):                       # n_way is small & static
        sw = s_ref[0, w]                         # (c, m_s_pad) bf16

        @pl.loop(0, n_chunks)
        def _chunk(ci):
            r0 = pl.multiple_of(ci * chunk_rows, chunk_rows)
            qc = qn_ref[pl.ds(r0, chunk_rows), :]            # (chunk_rows, c)
            # fused per-chunk similarity: MXU matmul, f32 accumulate
            vals = jnp.dot(qc, sw, preferred_element_type=jnp.float32)
            if pad_bias is not None:
                vals = vals + pad_bias                       # 1 broadcast add
            acc = jnp.zeros((chunk_rows, 1), jnp.float32)
            for _ in range(neighbor_k):                      # k tiny, unrolled
                mx = jnp.max(vals, axis=-1, keepdims=True)
                # mask only the FIRST occurrence of the max -> exact torch.topk
                # multiset semantics when similarities tie.
                first = jnp.min(jnp.where(vals == mx, lane, m_s_pad),
                                axis=-1, keepdims=True)
                acc = acc + mx
                vals = jnp.where(lane == first, -jnp.inf, vals)
            # per-row top-k mean for this class
            tk_ref[pl.ds(r0, chunk_rows), pl.ds(w, 1)] = acc * inv_k

    # one reshape + one sublane reduce + one store (no per-class relayouts)
    tk = tk_ref[...]                                         # (rows, n_way)
    per_img = jnp.sum(tk.reshape(tile_nq, m_q_pad, n_way), axis=1)
    o_ref[0, 0] = per_img.astype(o_ref.dtype)                # (tile_nq, n_way)


def dn4_similarity(support_xf, query_xf, *, n_way, k_shot, neighbor_k,
                   tile_nq=None, chunk_rows=None, vmem_limit_bytes=None):
    """Returns the DN4 similarity matrix of shape [b*q, n_way]."""
    b, q, c, h, w = query_xf.shape
    s = support_xf.shape[1]
    assert s == n_way * k_shot, "support set must be class-sorted n_way*k_shot"
    m_q = h * w
    m_s = k_shot * m_q
    assert 1 <= neighbor_k <= m_s, "neighbor_k must be in [1, k_shot*h*w]"
    m_q_pad = _round_up(m_q, 8)        # query rows   -> sublane aligned
    m_s_pad = _round_up(m_s, 128)      # support cols -> lane / MXU aligned

    if tile_nq is None:
        # ~1024 query-descriptor rows per grid step: big enough to amortize the
        # ~0.35us per-step overhead on v5e/v6e, and (with the chunked top-k +
        # bf16 support block) only a few MiB of per-step VMEM, so it is safe on
        # v7x's 64 MiB as well.
        tile_nq = max(1, min(q, 1024 // m_q_pad))
    tile_nq = max(1, min(tile_nq, q))
    q_pad = _round_up(q, tile_nq)
    n_qt = q_pad // tile_nq
    rows = tile_nq * m_q_pad

    if chunk_rows is None:
        for cand in (64, 32, 16, 8):   # rows is always a multiple of 8
            if rows % cand == 0:
                chunk_rows = cand
                break
    chunk_rows = min(chunk_rows, rows)
    assert rows % chunk_rows == 0

    # query: NCHW -> (b, q, hw, c), zero-pad hw -> m_q_pad and q -> q_pad,
    # flatten query-image-major.  Zero-padded descriptor rows are harmless:
    # their cosine sims are exactly 0, top-k mean is 0, so they add 0.
    qf = jnp.transpose(query_xf.reshape(b, q, c, m_q), (0, 1, 3, 2))
    qf = jnp.pad(qf, ((0, 0), (0, q_pad - q), (0, m_q_pad - m_q), (0, 0)))
    q_flat = qf.reshape(b, q_pad * m_q_pad, c)

    # support: (b, s, c, h, w) -> (b, n_way, c, k_shot*hw); cosine-normalize
    # over channels ONCE here (f32), cast bf16, zero-pad to m_s_pad.  Channels
    # on sublanes so the in-kernel matmul needs no transpose.
    sfm = support_xf.reshape(b, n_way, k_shot, c, m_q)
    sfm = jnp.transpose(sfm, (0, 1, 3, 2, 4)).reshape(b, n_way, c, m_s)
    sn = sfm * lax.rsqrt(jnp.maximum(jnp.sum(sfm * sfm, axis=2, keepdims=True),
                                     1e-24))
    s_flat = jnp.pad(sn.astype(jnp.bfloat16),
                     ((0, 0), (0, 0), (0, 0), (0, m_s_pad - m_s)))

    kernel = functools.partial(
        _dn4_kernel, n_way=n_way, m_q_pad=m_q_pad, m_s_pad=m_s_pad, m_s=m_s,
        tile_nq=tile_nq, neighbor_k=neighbor_k, chunk_rows=chunk_rows)

    out = pl.pallas_call(
        kernel,
        out_shape=jax.ShapeDtypeStruct((b, n_qt, tile_nq, n_way), jnp.float32),
        grid=(b, n_qt),                 # batch outer: support block index is
        in_specs=[                      # constant across the inner tile axis
            pl.BlockSpec((1, rows, c), lambda i, t: (i, t, 0)),
            pl.BlockSpec((1, n_way, c, m_s_pad), lambda i, t: (i, 0, 0, 0)),
        ],
        out_specs=pl.BlockSpec((1, 1, tile_nq, n_way), lambda i, t: (i, t, 0, 0)),
        scratch_shapes=[
            pltpu.VMEM((rows, c), jnp.bfloat16),       # normalized query tile
            pltpu.VMEM((rows, n_way), jnp.float32),    # per-row top-k means
        ],
        compiler_params=pltpu.CompilerParams(
            dimension_semantics=("parallel", "parallel"),
            vmem_limit_bytes=vmem_limit_bytes),
    )(q_flat, s_flat)

    out = out.reshape(b, q_pad, n_way)[:, :q]
    return out.reshape(b * q, n_way)


def dn4_forward(support_xf, support_y, query_xf, query_y, unlabeled_xf=None, *,
                n_way, k_shot, neighbor_k, temperature, training=False):
    b, q = query_xf.shape[:2]
    sim = dn4_similarity(support_xf, query_xf,
                         n_way=n_way, k_shot=k_shot, neighbor_k=neighbor_k)
    y = query_y.reshape(b * q)
    if training:
        logits = sim / temperature
        logp = jax.nn.log_softmax(logits, axis=-1)
        loss = -jnp.mean(jnp.take_along_axis(logp, y[:, None], axis=-1))
        return {"dn4_loss": loss}
    pred = jnp.argmax(sim, axis=1)
    # TODO(synk): PyTorch returns a Python list of 0/1 rewards; we return an int32 array.
    rewards = (pred == y).astype(jnp.int32)
    return rewards


def dn4_reference(support_xf, query_xf, *, n_way, k_shot, neighbor_k):
    """Pure-JAX reference (InnerproductSimilarity cosine + topk path).

    Mirrors the kernel's bf16 matmul operands (f32 accumulation) so the check
    stays tight; the kernel matches PyTorch up to that bf16 operand cast.
    """
    b, q, c, h, w = query_xf.shape
    qf = query_xf.reshape(b, q, c, h * w)
    qf = qf / jnp.maximum(jnp.linalg.norm(qf, axis=2, keepdims=True), 1e-12)
    sf = support_xf.reshape(b, n_way, k_shot, c, h * w)
    sf = jnp.transpose(sf, (0, 1, 3, 2, 4)).reshape(b, n_way, c, k_shot * h * w)
    sf = sf / jnp.maximum(jnp.linalg.norm(sf, axis=2, keepdims=True), 1e-12)
    inner = jnp.einsum('bqcm,bwcn->bqwmn',
                       qf.astype(jnp.bfloat16), sf.astype(jnp.bfloat16),
                       preferred_element_type=jnp.float32)    # [b,q,n_way,Mq,Ms]
    topv = jax.lax.top_k(inner, neighbor_k)[0]                # topk over Ms
    sim = topv.mean(-1).reshape(b, q, n_way, -1).sum(-1)      # [b,q,n_way]
    return sim.reshape(b * q, n_way)


if __name__ == "__main__":
    key = jax.random.PRNGKey(0)
    b, n_way, k_shot, q, c, h, w = 2, 3, 2, 5, 64, 4, 4
    neighbor_k = 3
    temperature = 2.0
    s = n_way * k_shot

    k1, k2, k3 = jax.random.split(key, 3)
    support_xf = jax.random.normal(k1, (b, s, c, h, w), jnp.float32)
    query_xf = jax.random.normal(k2, (b, q, c, h, w), jnp.float32)
    support_y = jnp.tile(jnp.repeat(jnp.arange(n_way), k_shot)[None, :], (b, 1))
    query_y = jax.random.randint(k3, (b, q), 0, n_way)

    ref = dn4_reference(support_xf, query_xf,
                        n_way=n_way, k_shot=k_shot, neighbor_k=neighbor_k)

    # explicit small query tile: exercises q padding (5 -> 6), the query-tile
    # grid axis (n_qt = 3) and m_s lane padding (32 -> 128)
    sim = dn4_similarity(support_xf, query_xf, n_way=n_way, k_shot=k_shot,
                         neighbor_k=neighbor_k, tile_nq=2)
    sim = jax.block_until_ready(sim)
    np.testing.assert_allclose(np.asarray(sim), np.asarray(ref),
                               rtol=2e-2, atol=2e-2)

    # default tiling: tile_nq=5 -> rows=80, chunk_rows=16 -> 5 chunks per class
    # (exercises the multi-chunk top-k path)
    sim_d = dn4_similarity(support_xf, query_xf, n_way=n_way, k_shot=k_shot,
                           neighbor_k=neighbor_k)
    sim_d = jax.block_until_ready(sim_d)
    np.testing.assert_allclose(np.asarray(sim_d), np.asarray(ref),
                               rtol=2e-2, atol=2e-2)

    # eval branch (rewards) and training branch (cross-entropy loss)
    rewards = dn4_forward(support_xf, support_y, query_xf, query_y, None,
                          n_way=n_way, k_shot=k_shot, neighbor_k=neighbor_k,
                          temperature=temperature, training=False)
    rewards = jax.block_until_ready(rewards)
    loss = dn4_forward(support_xf, support_y, query_xf, query_y, None,
                       n_way=n_way, k_shot=k_shot, neighbor_k=neighbor_k,
                       temperature=temperature, training=True)["dn4_loss"]
    jax.block_until_ready(loss)

    print("KERNEL_OK")
</pallas_src>

<mosaic_0001>
module attributes {stable_mosaic.version = 11 : i64} {
  func.func @_dn4_kernel(%arg0: i32, %arg1: i32, %arg2: memref<1x32x64xf32, #tpu.memory_space<vmem>>, %arg3: memref<1x3x64x128xbf16, #tpu.memory_space<vmem>>, %arg4: memref<1x1x2x3xf32, #tpu.memory_space<vmem>>, %arg5: memref<32x64xbf16, #tpu.memory_space<vmem>>, %arg6: memref<32x3xf32, #tpu.memory_space<vmem>>) attributes {dimension_semantics = [#tpu.dimension_semantics<parallel>, #tpu.dimension_semantics<parallel>], iteration_bounds = array<i64: 2, 3>, scalar_prefetch = 0 : i64, scratch_operands = 2 : i64, tpu.core_type = #tpu.core_type<tc>, window_params = [{transform_indices = @transform_0, window_bounds = array<i64: 1, 32, 64>}, {transform_indices = @transform_1, window_bounds = array<i64: 1, 3, 64, 128>}, {transform_indices = @transform_2, window_bounds = array<i64: 1, 1, 2, 3>}]} {
    %c0 = arith.constant 0 : index
    %c0_0 = arith.constant 0 : index
    %c0_1 = arith.constant 0 : index
    %0 = vector.load %arg2[%c0, %c0_0, %c0_1] : memref<1x32x64xf32, #tpu.memory_space<vmem>>, vector<1x32x64xf32>
    %1 = vector.shape_cast %0 : vector<1x32x64xf32> to vector<32x64xf32>
    %2 = arith.mulf %1, %1 : vector<32x64xf32>
    %cst = arith.constant dense<0.000000e+00> : vector<32xf32>
    %3 = vector.multi_reduction <add>, %2, %cst [1] : vector<32x64xf32> to vector<32xf32>
    %4 = vector.shape_cast %3 : vector<32xf32> to vector<32x1xf32>
    %cst_2 = arith.constant 1.000000e-24 : f32
    %5 = vector.broadcast %cst_2 : f32 to vector<32x1xf32>
    %6 = arith.maximumf %4, %5 : vector<32x1xf32>
    %7 = math.rsqrt %6 : vector<32x1xf32>
    %8 = vector.broadcast %7 : vector<32x1xf32> to vector<32x64xf32>
    %9 = arith.mulf %1, %8 : vector<32x64xf32>
    %10 = arith.truncf %9 : vector<32x64xf32> to vector<32x64xbf16>
    %c0_3 = arith.constant 0 : index
    %c0_4 = arith.constant 0 : index
    %11 = vector.load %arg5[%c0_3, %c0_4] : memref<32x64xbf16, #tpu.memory_space<vmem>>, vector<32x64xbf16>
    tpu.vector_store %arg5[%c0_3, %c0_4], %10 {strides = array<i32>} : memref<32x64xbf16, #tpu.memory_space<vmem>>, vector<32x64xbf16>,
    %12 = tpu.iota {dimensions = array<i32: 1>} : vector<1x128xi32>
    %c32_i32 = arith.constant 32 : i32
    %13 = vector.broadcast %c32_i32 : i32 to vector<1x128xi32>
    %14 = arith.cmpi slt, %12, %13 : vector<1x128xi32>
    %cst_5 = arith.constant 0.000000e+00 : f32
    %cst_6 = arith.constant -1.000000e+30 : f32
    %15 = vector.broadcast %cst_5 : f32 to vector<1x128xf32>
    %16 = vector.broadcast %cst_6 : f32 to vector<1x128xf32>
    %17 = arith.select %14, %15, %16 : vector<1x128xi1>, vector<1x128xf32>
    %c0_7 = arith.constant 0 : index
    %c0_8 = arith.constant 0 : index
    %c0_9 = arith.constant 0 : index
    %c0_10 = arith.constant 0 : index
    %18 = vector.load %arg3[%c0_7, %c0_8, %c0_9, %c0_10] : memref<1x3x64x128xbf16, #tpu.memory_space<vmem>>, vector<1x1x64x128xbf16>
    %19 = vector.shape_cast %18 : vector<1x1x64x128xbf16> to vector<64x128xbf16>
    %cst_11 = arith.constant 0.333333343 : f32
    %c0_i32 = arith.constant 0 : i32
    %c1_i32 = arith.constant 1 : i32
    %20 = arith.muli %c0_i32, %c1_i32 : i32
    %c0_i32_12 = arith.constant 0 : i32
    %21 = arith.addi %c0_i32_12, %20 : i32
    %c32_i32_13 = arith.constant 32 : i32
    %22 = arith.muli %21, %c32_i32_13 : i32
    %23 = tpu.assume_multiple %22, 32 : i32
    %24 = arith.index_cast %23 : i32 to index
    %c0_14 = arith.constant 0 : index
    %25 = vector.load %arg5[%24, %c0_14] : memref<32x64xbf16, #tpu.memory_space<vmem>>, vector<32x64xbf16>
    %cst_15 = arith.constant dense<0.000000e+00> : vector<32x128xf32>
    %26 = tpu.matmul %25, %19, %cst_15 {dimension_numbers = #tpu.dot_dimension_numbers<[1], [0], [0], [1], [0, 0, 1, 1], [], []>} : vector<32x64xbf16>, vector<64x128xbf16>, vector<32x128xf32> -> vector<32x128xf32>
    %27 = vector.broadcast %17 : vector<1x128xf32> to vector<32x128xf32>
    %28 = arith.addf %26, %27 : vector<32x128xf32>
    %cst_16 = arith.constant 0.000000e+00 : f32
    %29 = vector.broadcast %cst_16 : f32 to vector<32x1xf32>
    %cst_17 = arith.constant dense<0xFF800000> : vector<32xf32>
    %30 = vector.multi_reduction <maximumf>, %28, %cst_17 [1] : vector<32x128xf32> to vector<32xf32>
    %31 = vector.shape_cast %30 : vector<32xf32> to vector<32x1xf32>
    %32 = vector.broadcast %31 : vector<32x1xf32> to vector<32x128xf32>
    %33 = arith.cmpf oeq, %28, %32 : vector<32x128xf32>
    %c128_i32 = arith.constant 128 : i32
    %34 = vector.shape_cast %12 : vector<1x128xi32> to vector<1x128xi32>
    %35 = vector.broadcast %34 : vector<1x128xi32> to vector<32x128xi32>
    %36 = vector.broadcast %c128_i32 : i32 to vector<32x128xi32>
    %37 = arith.select %33, %35, %36 : vector<32x128xi1>, vector<32x128xi32>
    %cst_18 = arith.constant dense<2147483647> : vector<32xi32>
    %38 = vector.multi_reduction <minsi>, %37, %cst_18 [1] : vector<32x128xi32> to vector<32xi32>
    %39 = vector.shape_cast %38 : vector<32xi32> to vector<32x1xi32>
    %40 = arith.addf %29, %31 : vector<32x1xf32>
    %41 = vector.broadcast %12 : vector<1x128xi32> to vector<32x128xi32>
    %42 = vector.broadcast %39 : vector<32x1xi32> to vector<32x128xi32>
    %43 = arith.cmpi eq, %41, %42 : vector<32x128xi32>
    %cst_19 = arith.constant 0xFF800000 : f32
    %44 = vector.broadcast %cst_19 : f32 to vector<32x128xf32>
    %45 = arith.select %43, %44, %28 : vector<32x128xi1>, vector<32x128xf32>
    %cst_20 = arith.constant dense<0xFF800000> : vector<32xf32>
    %46 = vector.multi_reduction <maximumf>, %45, %cst_20 [1] : vector<32x128xf32> to vector<32xf32>
    %47 = vector.shape_cast %46 : vector<32xf32> to vector<32x1xf32>
    %48 = vector.broadcast %47 : vector<32x1xf32> to vector<32x128xf32>
    %49 = arith.cmpf oeq, %45, %48 : vector<32x128xf32>
    %c128_i32_21 = arith.constant 128 : i32
    %50 = vector.shape_cast %12 : vector<1x128xi32> to vector<1x128xi32>
    %51 = vector.broadcast %50 : vector<1x128xi32> to vector<32x128xi32>
    %52 = vector.broadcast %c128_i32_21 : i32 to vector<32x128xi32>
    %53 = arith.select %49, %51, %52 : vector<32x128xi1>, vector<32x128xi32>
    %cst_22 = arith.constant dense<2147483647> : vector<32xi32>
    %54 = vector.multi_reduction <minsi>, %53, %cst_22 [1] : vector<32x128xi32> to vector<32xi32>
    %55 = vector.shape_cast %54 : vector<32xi32> to vector<32x1xi32>
    %56 = arith.addf %40, %47 : vector<32x1xf32>
    %57 = vector.broadcast %12 : vector<1x128xi32> to vector<32x128xi32>
    %58 = vector.broadcast %55 : vector<32x1xi32> to vector<32x128xi32>
    %59 = arith.cmpi eq, %57, %58 : vector<32x128xi32>
    %cst_23 = arith.constant 0xFF800000 : f32
    %60 = vector.broadcast %cst_23 : f32 to vector<32x128xf32>
    %61 = arith.select %59, %60, %45 : vector<32x128xi1>, vector<32x128xf32>
    %cst_24 = arith.constant dense<0xFF800000> : vector<32xf32>
    %62 = vector.multi_reduction <maximumf>, %61, %cst_24 [1] : vector<32x128xf32> to vector<32xf32>
    %63 = vector.shape_cast %62 : vector<32xf32> to vector<32x1xf32>
    %64 = arith.addf %56, %63 : vector<32x1xf32>
    %65 = vector.broadcast %cst_11 : f32 to vector<32x1xf32>
    %66 = arith.mulf %64, %65 : vector<32x1xf32>
    %67 = arith.index_cast %23 : i32 to index
    %c0_25 = arith.constant 0 : index
    %68 = vector.load %arg6[%67, %c0_25] : memref<32x3xf32, #tpu.memory_space<vmem>>, vector<32x1xf32>
    tpu.vector_store %arg6[%67, %c0_25], %66 {strides = array<i32>} : memref<32x3xf32, #tpu.memory_space<vmem>>, vector<32x1xf32>,
    %c1_i32_26 = arith.constant 1 : i32
    %c0_27 = arith.constant 0 : index
    %c1 = arith.constant 1 : index
    %c0_28 = arith.constant 0 : index
    %c0_29 = arith.constant 0 : index
    %69 = vector.load %arg3[%c0_27, %c1, %c0_28, %c0_29] : memref<1x3x64x128xbf16, #tpu.memory_space<vmem>>, vector<1x1x64x128xbf16>
    %70 = vector.shape_cast %69 : vector<1x1x64x128xbf16> to vector<64x128xbf16>
    %cst_30 = arith.constant 0.333333343 : f32
    %c0_i32_31 = arith.constant 0 : i32
    %c1_i32_32 = arith.constant 1 : i32
    %71 = arith.muli %c0_i32_31, %c1_i32_32 : i32
    %c0_i32_33 = arith.constant 0 : i32
    %72 = arith.addi %c0_i32_33, %71 : i32
    %c32_i32_34 = arith.constant 32 : i32
    %73 = arith.muli %72, %c32_i32_34 : i32
    %74 = tpu.assume_multiple %73, 32 : i32
    %75 = arith.index_cast %74 : i32 to index
    %c0_35 = arith.constant 0 : index
    %76 = vector.load %arg5[%75, %c0_35] : memref<32x64xbf16, #tpu.memory_space<vmem>>, vector<32x64xbf16>
    %cst_36 = arith.constant dense<0.000000e+00> : vector<32x128xf32>
    %77 = tpu.matmul %76, %70, %cst_36 {dimension_numbers = #tpu.dot_dimension_numbers<[1], [0], [0], [1], [0, 0, 1, 1], [], []>} : vector<32x64xbf16>, vector<64x128xbf16>, vector<32x128xf32> -> vector<32x128xf32>
    %78 = vector.broadcast %17 : vector<1x128xf32> to vector<32x128xf32>
    %79 = arith.addf %77, %78 : vector<32x128xf32>
    %cst_37 = arith.constant 0.000000e+00 : f32
    %80 = vector.broadcast %cst_37 : f32 to vector<32x1xf32>
    %cst_38 = arith.constant dense<0xFF800000> : vector<32xf32>
    %81 = vector.multi_reduction <maximumf>, %79, %cst_38 [1] : vector<32x128xf32> to vector<32xf32>
    %82 = vector.shape_cast %81 : vector<32xf32> to vector<32x1xf32>
    %83 = vector.broadcast %82 : vector<32x1xf32> to vector<32x128xf32>
    %84 = arith.cmpf oeq, %79, %83 : vector<32x128xf32>
    %c128_i32_39 = arith.constant 128 : i32
    %85 = vector.shape_cast %12 : vector<1x128xi32> to vector<1x128xi32>
    %86 = vector.broadcast %85 : vector<1x128xi32> to vector<32x128xi32>
    %87 = vector.broadcast %c128_i32_39 : i32 to vector<32x128xi32>
    %88 = arith.select %84, %86, %87 : vector<32x128xi1>, vector<32x128xi32>
    %cst_40 = arith.constant dense<2147483647> : vector<32xi32>
    %89 = vector.multi_reduction <minsi>, %88, %cst_40 [1] : vector<32x128xi32> to vector<32xi32>
    %90 = vector.shape_cast %89 : vector<32xi32> to vector<32x1xi32>
    %91 = arith.addf %80, %82 : vector<32x1xf32>
    %92 = vector.broadcast %12 : vector<1x128xi32> to vector<32x128xi32>
    %93 = vector.broadcast %90 : vector<32x1xi32> to vector<32x128xi32>
    %94 = arith.cmpi eq, %92, %93 : vector<32x128xi32>
    %cst_41 = arith.constant 0xFF800000 : f32
    %95 = vector.broadcast %cst_41 : f32 to vector<32x128xf32>
    %96 = arith.select %94, %95, %79 : vector<32x128xi1>, vector<32x128xf32>
    %cst_42 = arith.constant dense<0xFF800000> : vector<32xf32>
    %97 = vector.multi_reduction <maximumf>, %96, %cst_42 [1] : vector<32x128xf32> to vector<32xf32>
    %98 = vector.shape_cast %97 : vector<32xf32> to vector<32x1xf32>
    %99 = vector.broadcast %98 : vector<32x1xf32> to vector<32x128xf32>
    %100 = arith.cmpf oeq, %96, %99 : vector<32x128xf32>
    %c128_i32_43 = arith.constant 128 : i32
    %101 = vector.shape_cast %12 : vector<1x128xi32> to vector<1x128xi32>
    %102 = vector.broadcast %101 : vector<1x128xi32> to vector<32x128xi32>
    %103 = vector.broadcast %c128_i32_43 : i32 to vector<32x128xi32>
    %104 = arith.select %100, %102, %103 : vector<32x128xi1>, vector<32x128xi32>
    %cst_44 = arith.constant dense<2147483647> : vector<32xi32>
    %105 = vector.multi_reduction <minsi>, %104, %cst_44 [1] : vector<32x128xi32> to vector<32xi32>
    %106 = vector.shape_cast %105 : vector<32xi32> to vector<32x1xi32>
    %107 = arith.addf %91, %98 : vector<32x1xf32>
    %108 = vector.broadcast %12 : vector<1x128xi32> to vector<32x128xi32>
    %109 = vector.broadcast %106 : vector<32x1xi32> to vector<32x128xi32>
    %110 = arith.cmpi eq, %108, %109 : vector<32x128xi32>
    %cst_45 = arith.constant 0xFF800000 : f32
    %111 = vector.broadcast %cst_45 : f32 to vector<32x128xf32>
    %112 = arith.select %110, %111, %96 : vector<32x128xi1>, vector<32x128xf32>
    %cst_46 = arith.constant dense<0xFF800000> : vector<32xf32>
    %113 = vector.multi_reduction <maximumf>, %112, %cst_46 [1] : vector<32x128xf32> to vector<32xf32>
    %114 = vector.shape_cast %113 : vector<32xf32> to vector<32x1xf32>
    %115 = arith.addf %107, %114 : vector<32x1xf32>
    %116 = vector.broadcast %cst_30 : f32 to vector<32x1xf32>
    %117 = arith.mulf %115, %116 : vector<32x1xf32>
    %118 = arith.index_cast %74 : i32 to index
    %c1_47 = arith.constant 1 : index
    %119 = vector.load %arg6[%118, %c1_47] : memref<32x3xf32, #tpu.memory_space<vmem>>, vector<32x1xf32>
    tpu.vector_store %arg6[%118, %c1_47], %117 {strides = array<i32>} : memref<32x3xf32, #tpu.memory_space<vmem>>, vector<32x1xf32>,
    %c1_i32_48 = arith.constant 1 : i32
    %c0_49 = arith.constant 0 : index
    %c2 = arith.constant 2 : index
    %c0_50 = arith.constant 0 : index
    %c0_51 = arith.constant 0 : index
    %120 = vector.load %arg3[%c0_49, %c2, %c0_50, %c0_51] : memref<1x3x64x128xbf16, #tpu.memory_space<vmem>>, vector<1x1x64x128xbf16>
    %121 = vector.shape_cast %120 : vector<1x1x64x128xbf16> to vector<64x128xbf16>
    %cst_52 = arith.constant 0.333333343 : f32
    %c0_i32_53 = arith.constant 0 : i32
    %c1_i32_54 = arith.constant 1 : i32
    %122 = arith.muli %c0_i32_53, %c1_i32_54 : i32
    %c0_i32_55 = arith.constant 0 : i32
    %123 = arith.addi %c0_i32_55, %122 : i32
    %c32_i32_56 = arith.constant 32 : i32
    %124 = arith.muli %123, %c32_i32_56 : i32
    %125 = tpu.assume_multiple %124, 32 : i32
    %126 = arith.index_cast %125 : i32 to index
    %c0_57 = arith.constant 0 : index
    %127 = vector.load %arg5[%126, %c0_57] : memref<32x64xbf16, #tpu.memory_space<vmem>>, vector<32x64xbf16>
    %cst_58 = arith.constant dense<0.000000e+00> : vector<32x128xf32>
    %128 = tpu.matmul %127, %121, %cst_58 {dimension_numbers = #tpu.dot_dimension_numbers<[1], [0], [0], [1], [0, 0, 1, 1], [], []>} : vector<32x64xbf16>, vector<64x128xbf16>, vector<32x128xf32> -> vector<32x128xf32>
    %129 = vector.broadcast %17 : vector<1x128xf32> to vector<32x128xf32>
    %130 = arith.addf %128, %129 : vector<32x128xf32>
    %cst_59 = arith.constant 0.000000e+00 : f32
    %131 = vector.broadcast %cst_59 : f32 to vector<32x1xf32>
    %cst_60 = arith.constant dense<0xFF800000> : vector<32xf32>
    %132 = vector.multi_reduction <maximumf>, %130, %cst_60 [1] : vector<32x128xf32> to vector<32xf32>
    %133 = vector.shape_cast %132 : vector<32xf32> to vector<32x1xf32>
    %134 = vector.broadcast %133 : vector<32x1xf32> to vector<32x128xf32>
    %135 = arith.cmpf oeq, %130, %134 : vector<32x128xf32>
    %c128_i32_61 = arith.constant 128 : i32
    %136 = vector.shape_cast %12 : vector<1x128xi32> to vector<1x128xi32>
    %137 = vector.broadcast %136 : vector<1x128xi32> to vector<32x128xi32>
    %138 = vector.broadcast %c128_i32_61 : i32 to vector<32x128xi32>
    %139 = arith.select %135, %137, %138 : vector<32x128xi1>, vector<32x128xi32>
    %cst_62 = arith.constant dense<2147483647> : vector<32xi32>
    %140 = vector.multi_reduction <minsi>, %139, %cst_62 [1] : vector<32x128xi32> to vector<32xi32>
    %141 = vector.shape_cast %140 : vector<32xi32> to vector<32x1xi32>
    %142 = arith.addf %131, %133 : vector<32x1xf32>
    %143 = vector.broadcast %12 : vector<1x128xi32> to vector<32x128xi32>
    %144 = vector.broadcast %141 : vector<32x1xi32> to vector<32x128xi32>
    %145 = arith.cmpi eq, %143, %144 : vector<32x128xi32>
    %cst_63 = arith.constant 0xFF800000 : f32
    %146 = vector.broadcast %cst_63 : f32 to vector<32x128xf32>
    %147 = arith.select %145, %146, %130 : vector<32x128xi1>, vector<32x128xf32>
    %cst_64 = arith.constant dense<0xFF800000> : vector<32xf32>
    %148 = vector.multi_reduction <maximumf>, %147, %cst_64 [1] : vector<32x128xf32> to vector<32xf32>
    %149 = vector.shape_cast %148 : vector<32xf32> to vector<32x1xf32>
    %150 = vector.broadcast %149 : vector<32x1xf32> to vector<32x128xf32>
    %151 = arith.cmpf oeq, %147, %150 : vector<32x128xf32>
    %c128_i32_65 = arith.constant 128 : i32
    %152 = vector.shape_cast %12 : vector<1x128xi32> to vector<1x128xi32>
    %153 = vector.broadcast %152 : vector<1x128xi32> to vector<32x128xi32>
    %154 = vector.broadcast %c128_i32_65 : i32 to vector<32x128xi32>
    %155 = arith.select %151, %153, %154 : vector<32x128xi1>, vector<32x128xi32>
    %cst_66 = arith.constant dense<2147483647> : vector<32xi32>
    %156 = vector.multi_reduction <minsi>, %155, %cst_66 [1] : vector<32x128xi32> to vector<32xi32>
    %157 = vector.shape_cast %156 : vector<32xi32> to vector<32x1xi32>
    %158 = arith.addf %142, %149 : vector<32x1xf32>
    %159 = vector.broadcast %12 : vector<1x128xi32> to vector<32x128xi32>
    %160 = vector.broadcast %157 : vector<32x1xi32> to vector<32x128xi32>
    %161 = arith.cmpi eq, %159, %160 : vector<32x128xi32>
    %cst_67 = arith.constant 0xFF800000 : f32
    %162 = vector.broadcast %cst_67 : f32 to vector<32x128xf32>
    %163 = arith.select %161, %162, %147 : vector<32x128xi1>, vector<32x128xf32>
    %cst_68 = arith.constant dense<0xFF800000> : vector<32xf32>
    %164 = vector.multi_reduction <maximumf>, %163, %cst_68 [1] : vector<32x128xf32> to vector<32xf32>
    %165 = vector.shape_cast %164 : vector<32xf32> to vector<32x1xf32>
    %166 = arith.addf %158, %165 : vector<32x1xf32>
    %167 = vector.broadcast %cst_52 : f32 to vector<32x1xf32>
    %168 = arith.mulf %166, %167 : vector<32x1xf32>
    %169 = arith.index_cast %125 : i32 to index
    %c2_69 = arith.constant 2 : index
    %170 = vector.load %arg6[%169, %c2_69] : memref<32x3xf32, #tpu.memory_space<vmem>>, vector<32x1xf32>
    tpu.vector_store %arg6[%169, %c2_69], %168 {strides = array<i32>} : memref<32x3xf32, #tpu.memory_space<vmem>>, vector<32x1xf32>,
    %c1_i32_70 = arith.constant 1 : i32
    %c0_71 = arith.constant 0 : index
    %c0_72 = arith.constant 0 : index
    %171 = vector.load %arg6[%c0_71, %c0_72] : memref<32x3xf32, #tpu.memory_space<vmem>>, vector<32x3xf32>
    %172 = vector.shape_cast %171 : vector<32x3xf32> to vector<2x16x3xf32>
    %cst_73 = arith.constant dense<0.000000e+00> : vector<2x3xf32>
    %173 = vector.multi_reduction <add>, %172, %cst_73 [1] : vector<2x16x3xf32> to vector<2x3xf32>
    %c0_74 = arith.constant 0 : index
    %c0_75 = arith.constant 0 : index
    %c0_76 = arith.constant 0 : index
    %c0_77 = arith.constant 0 : index
    %174 = vector.load %arg4[%c0_74, %c0_75, %c0_76, %c0_77] : memref<1x1x2x3xf32, #tpu.memory_space<vmem>>, vector<1x1x2x3xf32>
    %175 = vector.shape_cast %174 : vector<1x1x2x3xf32> to vector<2x3xf32>
    %176 = vector.shape_cast %173 : vector<2x3xf32> to vector<1x1x2x3xf32>
    tpu.vector_store %arg4[%c0_74, %c0_75, %c0_76, %c0_77], %176 {strides = array<i32>} : memref<1x1x2x3xf32, #tpu.memory_space<vmem>>, vector<1x1x2x3xf32>,
    return
  }
  func.func @transform_0(%arg0: i32, %arg1: i32) -> (i32, i32, i32) {
    %c0_i32 = arith.constant 0 : i32
    %c0_i32_0 = arith.constant 0 : i32
    return %arg0, %arg1, %c0_i32 : i32, i32, i32
  }
  func.func @transform_1(%arg0: i32, %arg1: i32) -> (i32, i32, i32, i32) {
    %c0_i32 = arith.constant 0 : i32
    %c0_i32_0 = arith.constant 0 : i32
    %c0_i32_1 = arith.constant 0 : i32
    %c0_i32_2 = arith.constant 0 : i32
    return %arg0, %c0_i32, %c0_i32_0, %c0_i32_1 : i32, i32, i32, i32
  }
  func.func @transform_2(%arg0: i32, %arg1: i32) -> (i32, i32, i32, i32) {
    %c0_i32 = arith.constant 0 : i32
    %c0_i32_0 = arith.constant 0 : i32
    %c0_i32_1 = arith.constant 0 : i32
    return %arg0, %arg1, %c0_i32, %c0_i32_0 : i32, i32, i32, i32
  }
}

</mosaic_0001>

<bundles_post_ra>
// kernel: tpu_custom_call.1
= control target key start
LH: loop header
LB: loop body
LE: loop exit
PB: predicated region body
PF: predicated region fallthrough
CT: control target
= control target key end

     0   :  { %7 = vsyncpa [#allocation5], 0  ;;  %s2247_s0 = inlined_call_operand.vmem [shape: f32[2,96,64], index: 0, kind: input, shape index: {}]   ;;  %s2248_s1 = inlined_call_operand.vmem [shape: bf16[2,3,64,128], index: 1, kind: input, shape index: {}]   ;;  %s2249_s2 = inlined_call_operand.hbm [shape: f32[2,3,2,3], index: 2, kind: output, shape index: {}]  }
   0x1   :  { %9 = vsyncpa [#allocation5 + $0x1], 0  ;;  %s1515_s9 = smov 0   ;;  %s1517_s10 = smov 0  }
   0x2   :  { %s1519_s11 = smov 0   ;;  %s1521_s12 = smov 0  }
   0x3   :  { %s1523_s13 = smov 0   ;;  %s1525_s14 = smov 0  }
   0x4   :  { %s1527_s15 = smov 0   ;;  %s1529_s16 = smov 0  }
   0x5 LB: > { %s1206_s17 = sadd.s32 4294967295, %s1496_s16   ;;  %s1207_s18 = sadd.s32 4294967294, %s1496_s16   ;;  %s1496_s16 = sphi %s1529_s16, %s15_s16   ;;  %s1492_s15 = sphi %s1527_s15, %s2279_s15   ;;  %s1488_s14 = sphi %s1525_s14, %s2278_s14   ;;  %s1484_s13 = sphi %s1523_s13, %s2277_s13   ;;  %s1480_s12 = sphi %s1521_s12, %s2276_s12   ;;  %s1476_s11 = sphi %s1519_s11, %s2275_s11   ;;  %s1472_s10 = sphi %s1517_s10, %s2274_s10   ;;  %s1468_s9 = sphi %s1515_s9, %s2273_s9  }
   0x6   : > { %s24_s19 = sadd.s32 1, %s1488_s14  ;;  %s27_s20 = sadd.s32 1, %s1492_s15 }
   0x7   : > { %p25_p0 = scmp.ge.s32.totalorder %s24_s19, 3  ;;  %p100_p1 = scmp.ne.s32.totalorder %s1476_s11, %s1472_s10 }
   0x8   : > { %p101_p2 = scmp.eq.s32.totalorder %s1206_s17, 5  ;;  %p106_p5 = scmp.ne.s32.totalorder %s1472_s10, %s1468_s9 }
   0x9   : > { %s2281_s19 = smov (%p25_p0, %s24_s19), 0  ;;  %s2283_s20 = smov (!%p25_p0, %s27_s20), %s1492_s15 }
   0xa   : > { %s86_s21 = ssub.s32 %s1488_s14, %s2281_s19  ;;  %p1566_p3 = por %p101_p2, %p100_p1 }
   0xb   : > { %p29_p4 = scmp.ge.s32.totalorder %s2283_s20, 2  ;;  %p107_p6 = scmp.eq.s32.totalorder %s1207_s18, 5 }
   0xc   : > { %p1210_p7 = scmp.ge.s32.totalorder %s1496_s16, 1  ;;  %p146_p9 = scmp.lt.s32.totalorder %s1496_s16, 7 }
   0xd   : > { %s2285_s20 = smov (%p29_p4, %s2283_s20), 0  ;;  %p1575_p8 = por %p107_p6, %p106_p5 }
   0xe   : > { %s85_s24 = ssub.s32 %s1492_s15, %s2285_s20  ;;  %s90_s25 = sadd.s32 1, %s1476_s11 }
   0xf   : > { %s87_s26 = sor.u32 %s86_s21, %s85_s24  ;;  %p147_p10 = pnand %p1210_p7, %p146_p9 }
  0x10   : > { %p88_p11 = scmp.eq.s32.totalorder %s87_s26, 0 }
  0x11   : > { %150 = sbr.rel (%p147_p10) target bundleno = 1511 (0x5e7), region = 28 }
  0x12   : > { %s1584_s27 = scalar_select %p88_p11, %s1476_s11, %s90_s25  }
  0x18   : > { %s1212_s28 = sshll.u32 %s1480_s12, 2  ;;  %p178_p12 = scmp.lt.s32.totalorder %s1484_s13, 1  ;;  %vm201_vm0 = vcmask 523264   ;;  %v230_v44 = vlaneseq  ;;  %v1498_v46 = vmov -1e+30  }
  0x19   : > { %p180_p13 = scmp.lt.s32.totalorder %s1212_s28, 11  ;;  %s174_s24 = sand.u32 1, %s1472_s10  }
  0x1a   : > { %s179_s29 = scalar_select %p178_p12, %s1484_s13, 1  ;;  %v1621_v45 = vand.u32 127, %v230_v44 }
  0x1b   : > { %s2287_s28 = smov (!%p180_p13, %s1212_s28), 11  ;;  %s1309_s25 = smul.u32 3, %s1484_s13 }
  0x1c   : > { %s1307_s30 = smul.u32 12, %s179_s29  ;;  %vm232_vm1 = vcmp.lt.s32.totalorder %v1621_v45, 32  ;;  %s1211_s26 = sshll.u32 %s174_s24, 1 }
  0x1d   : > { %s1308_s3 = smul.u32 96, %s179_s29  ;;  %v233_v47 = vsel %vm232_vm1, 0.0, %v1498_v46  ;;  %s1499_s7 = smov [#allocation4]  }
  0x1e   : > { %s183_s4 = sadd.s32 %s1307_s30, %s2287_s28  ;;  %s1112_s28 = sadd.s32 %s1480_s12, %s1309_s25 }
  0x1f   : > { %s1213_s5 = sshll.u32 %s183_s4, 3  ;;  %s1592_s8 = scalar_lea.vmem %s2248_s1, %s1308_s3 }
  0x20   : > { %s185_s21 = scalar_lea.vmem %s2247_s0, %s1213_s5  ;;  %v1382_v12 = vld [vmem:[%s1592_s8] sm:$0xff]   ;;  %v1384_v14 = vld [vmem:[%s1592_s8 + $0x8] sm:$0xff]   ;;  %v1386_v16 = vld [vmem:[%s1592_s8 + $0x10] sm:$0xff]   ;;  %s1250_s29 = sshll.u32 %s1112_s28, 5 }
  0x21   : > { %v195_v0 = vld [vmem:[%s185_s21 + $0x10] sm:$0xff]  ;;  %v193_v1 = vld [vmem:[%s185_s21] sm:$0xff]  ;;  %v196_v2 = vld [vmem:[%s185_s21 + $0x18] sm:$0xff]  ;;  %1271 = vmatprep.subr.bf16.mxu0 %v1382_v12  ;;  %s176_s30 = scalar_lea.vmem [#allocation4], %s1211_s26  ;;  %s2194_s13 = scalar_lea.hbm %s2249_s2, %s1250_s29 }
  0x22   : > { %v199_v3 = vmul.f32 %v195_v0, %v195_v0  ;;  %v197_v4 = vmul.f32 %v193_v1, %v193_v1  ;;  %v200_v5 = vmul.f32 %v196_v2, %v196_v2  ;;  %v194_v6 = vld [vmem:[%s185_s21 + $0x8] sm:$0xff]  ;;  %v1383_v13 = vld [vmem:[%s1592_s8 + $0x20] sm:$0xff]   ;;  %1272 = vmatpush3.bf16.msra.mxu0 %v1382_v12  ;;  %v1387_v17 = vld [vmem:[%s1592_s8 + $0x30] sm:$0xff]   ;;  %s1116_s3 = sshll.u32 %s176_s30, 4  ;;  %s1101_s12 = scalar_lea.sflag [#allocation5], %s174_s24  ;;  %s2196_s3 = int_to_ptr.vmem [resolvable:$true] %s1116_s3 }
  0x23   : > { %v198_v7 = vmul.f32 %v194_v6, %v194_v6  ;;  %1283 = vmatprep.subr.bf16.mxu1 %v1383_v13  ;;  %v1385_v15 = vld [vmem:[%s1592_s8 + $0x28] sm:$0xff]   ;;  %1273 = vmatprep.subr.bf16.mxu0 %v1384_v14  ;;  %v1388_v18 = vld [vmem:[%s1592_s8 + $0x18] sm:$0xff]   ;;  %v1390_v20 = vld [vmem:[%s1592_s8 + $0x40] sm:$0xff]   ;;  %s1402_s6 = scalar_lea.vmem %s2196_s3, 32 }
  0x24   : > { %v208_v8 = vsel %vm201_vm0, %v199_v3, 0.0  ;;  %v202_v9 = vsel %vm201_vm0, %v197_v4, 0.0  ;;  %v211_v10 = vsel %vm201_vm0, %v200_v5, 0.0  ;;  %1284 = vmatpush3.bf16.msra.mxu1 %v1383_v13  ;;  %v1389_v19 = vld [vmem:[%s1592_s8 + $0x38] sm:$0xff]   ;;  %v1391_v41 = vld [vmem:[%s1592_s8 + $0x48] sm:$0xff]   ;;  %v1392_v42 = vld [vmem:[%s1592_s8 + $0x50] sm:$0xff]   ;;  %p1403_p0 = scmp.ne.s32.totalorder %s2196_s3, %s1402_s6 }
  0x25   : > { %209 = vadd.xlane.f32.xlu1 %v208_v8  ;;  %203 = vadd.xlane.f32.xlu0 %v202_v9  ;;  %v205_v11 = vsel %vm201_vm0, %v198_v7, 0.0  ;;  %v1393_v43 = vld [vmem:[%s1592_s8 + $0x58] sm:$0xff]   ;;  %s1406_s8 = sshll.u32 %s1499_s7, 4  ;;  %s1407_s8 = int_to_ptr.vmem [resolvable:$false] %s1406_s8 }
  0x26   : > { %1274 = vmatpush3.bf16.msra.mxu0 %v1384_v14  ;;  %1285 = vmatprep.subr.bf16.mxu1 %v1385_v15  ;;  %p1404_p1 = pnand %p1403_p0, %p1566_p3  ;;  %s1408_s17 = scalar_lea.vmem %s1407_s8, 64 }
  0x27   : > { %1275 = vmatprep.subr.bf16.mxu0 %v1386_v16  ;;  %p1409_p4 = scmp.lt.s32.totalorder %s2196_s3, %s1407_s8  ;;  %p1410_p5 = scmp.lt.s32.totalorder %s1408_s17, %s1402_s6 }
  0x28   : > { %1286 = vmatpush3.bf16.msra.mxu1 %v1385_v15  ;;  %p1405_p2 = pneg %p1404_p1 }
  0x29   : > { %212 = vadd.xlane.f32.xlu1 %v211_v10  ;;  %206 = vadd.xlane.f32.xlu0 %v205_v11  ;;  %p1411_p6 = por %p1410_p5, %p1409_p4 }
  0x2a   : > { %1276 = vmatpush3.bf16.msra.mxu0 %v1386_v16  ;;  %1287 = vmatprep.subr.bf16.mxu1 %v1387_v17 }
  0x2b   : > { %1277 = vmatprep.subr.bf16.mxu0 %v1388_v18  ;;  %p1412_p7 = pnand %p1411_p6, %p1405_p2 }
  0x2c   : > { %1288 = vmatpush3.bf16.msra.mxu1 %v1387_v17 }
  0x2d   : > { %1289 = vmatprep.subr.bf16.mxu1 %v1389_v19 }
  0x2e   : > { %1278 = vmatpush3.bf16.msra.mxu0 %v1388_v18 }
  0x2f   : > { %1295 = vmatprep.subr.bf16.mxu0 %v1390_v20 }
  0x30   : > { %1290 = vmatpush3.bf16.msra.mxu1 %v1389_v19 }
  0xb2   : > { %v210_v21 = vpop.xlane.xlu1 %209  ;;  %v204_v22 = vpop.xlane.xlu0 %203 }
  0xb3   : > { %v216_v23 = vmax.f32 %v210_v21, 1e-24  ;;  %v214_v24 = vmax.f32 %v204_v22, 1e-24 }
  0xb5   : > { %1394 = vrsqrt.f32 %v216_v23 }
  0xb6   : > { %v213_v25 = vpop.xlane.xlu1 %212  ;;  %v207_v26 = vpop.xlane.xlu0 %206  ;;  %1396 = vrsqrt.f32 %v214_v24 }
  0xb7   : > { %v217_v27 = vmax.f32 %v213_v25, 1e-24  ;;  %v215_v28 = vmax.f32 %v207_v26, 1e-24 }
  0xb9   : > { %1398 = vrsqrt.f32 %v217_v27 }
  0xba   : > { %1400 = vrsqrt.f32 %v215_v28 }
  0xbf   : > { %v1395_v29 = vpop.eup %1394 }
  0xc0   : > { %v1397_v30 = vpop.eup %1396  ;;  %v224_v33 = vmul.f32 %v1395_v29, %v195_v0 }
  0xc1   : > { %v222_v35 = vmul.f32 %v1397_v30, %v193_v1 }
  0xc3   : > { %v1399_v31 = vpop.eup %1398 }
  0xc4   : > { %v1401_v32 = vpop.eup %1400  ;;  %v225_v34 = vmul.f32 %v1399_v31, %v196_v2 }
  0xc5   : > { %v223_v36 = vmul.f32 %v1401_v32, %v194_v6 }
  0xc6   : > { %v227_v37 = vpack.c.bf16 %v225_v34, %v224_v33 }
  0xc7   : > { %v226_v38 = vpack.c.bf16 %v223_v36, %v222_v35 }
  0xc8   : > { %229 = vst.msk [vmem:[#allocation2 + $0x8] sm:$0xff] %vm201_vm0, %v227_v37 }
  0xc9   : > { %228 = vst.msk [vmem:[#allocation2] sm:$0xff] %vm201_vm0, %v226_v38 }
  0xcf   : > { %v243_v39 = vld [vmem:[#allocation2 + $0x8] sm:$0xff] }
  0xd0   : > { %v242_v40 = vld [vmem:[#allocation2] sm:$0xff] }
  0xd1   : > { %1279 = vmatprep.mubr.msk.bf16.mxu0 %vm201_vm0, %v242_v40  ;;  %1291 = vmatprep.mubr.msk.bf16.mxu1 %vm201_vm0, %v242_v40 }
  0xd2   : > { %1280 = vmatmul.mubr.msk.bf16.vlgmr.msra.gmra.mrb[0].mxu0 %vm201_vm0, %v243_v39  ;;  %1292 = vmatmul.mubr.msk.bf16.vlgmr.msra.gmra.mrb[0].mxu1 %vm201_vm0, %v243_v39 }
  0xd3   : > { %1296 = vmatpush3.bf16.msra.mxu0 %v1390_v20  ;;  %1303 = vmatprep.mubr.msk.bf16.mxu0 %vm201_vm0, %v242_v40 }
  0xd4   : > { %1297 = vmatprep.subr.bf16.mxu0 %v1391_v41 }
  0xd7   : > { %1298 = vmatpush3.bf16.msra.mxu0 %v1391_v41 }
  0xd8   : > { %1299 = vmatprep.subr.bf16.mxu0 %v1392_v42 }
  0xdb   : > { %1300 = vmatpush3.bf16.msra.mxu0 %v1392_v42 }
  0xdc   : > { %1301 = vmatprep.subr.bf16.mxu0 %v1393_v43 }
  0xdf   : > { %1302 = vmatpush3.bf16.msra.mxu0 %v1393_v43 }
  0xe2   : > { %1304 = vmatmul.mubr.msk.bf16.vlgmr.msra.gmra.mrb[4].mxu0 %vm201_vm0, %v243_v39 }
 0x1a5   : > { %v1281_v48 = vpop.f32.mrb[0].mxu0  ;;  %v1293_v49 = vpop.f32.mrb[0].mxu1 }
 0x1a6   : > { %v1624_v50 = vadd.f32 %v1281_v48, %v233_v47  ;;  %v308_v51 = vpop.f32.mrb[1].mxu0  ;;  %v587_v52 = vpop.f32.mrb[1].mxu1  ;;  %v1629_v58 = vadd.f32 %v1293_v49, %v233_v47 }
 0x1a7   : > { %v1282_v53 = vpop.f32.mrb[2].mxu0  ;;  %v1294_v54 = vpop.f32.mrb[2].mxu1  ;;  %v1635_v60 = vadd.f32 %v308_v51, %v233_v47  ;;  %v1641_v62 = vadd.f32 %v587_v52, %v233_v47 }
 0x1a8   : > { %v1626_v55 = vadd.f32 %v1282_v53, %v233_v47  ;;  %v590_v56 = vpop.f32.mrb[3].mxu1  ;;  %327 = vmax.xlane.f32.xlu0 %v1624_v50  ;;  %v311_v57 = vpop.f32.mrb[3].mxu0  ;;  %v1632_v59 = vadd.f32 %v1294_v54, %v233_v47 }
 0x1a9   : > { %v1638_v61 = vadd.f32 %v311_v57, %v233_v47  ;;  %v1644_v63 = vadd.f32 %v590_v56, %v233_v47 }
 0x1aa   : > { %329 = vmax.xlane.f32.xlu1 %v1626_v55 }
 0x1ac   : > { %606 = vmax.xlane.f32.xlu0 %v1629_v58 }
 0x1ae   : > { %608 = vmax.xlane.f32.xlu1 %v1632_v59 }
 0x1b0   : > { %323 = vmax.xlane.f32.xlu0 %v1635_v60 }
 0x1b2   : > { %325 = vmax.xlane.f32.xlu1 %v1638_v61 }
 0x1b4   : > { %602 = vmax.xlane.f32.xlu0 %v1641_v62 }
 0x1b5   : > { %v1305_v0 = vpop.f32.mrb[4].mxu0 }
 0x1b6   : > { %v866_v1 = vpop.f32.mrb[5].mxu0  ;;  %604 = vmax.xlane.f32.xlu1 %v1644_v63  ;;  %v1653_v6 = vadd.f32 %v1305_v0, %v233_v47 }
 0x1b7   : > { %v1648_v2 = vadd.f32 %v866_v1, %v233_v47  ;;  %v1306_v3 = vpop.f32.mrb[6].mxu0 }
 0x1b8   : > { %v869_v4 = vpop.f32.mrb[7].mxu0  ;;  %v1656_v7 = vadd.f32 %v1306_v3, %v233_v47 }
 0x1b9   : > { %v1650_v5 = vadd.f32 %v869_v4, %v233_v47  ;;  %881 = vmax.xlane.f32.xlu0 %v1648_v2 }
 0x1bb   : > { %883 = vmax.xlane.f32.xlu1 %v1650_v5 }
 0x1bd   : > { %885 = vmax.xlane.f32.xlu0 %v1653_v6 }
 0x1bf   : > { %887 = vmax.xlane.f32.xlu1 %v1656_v7 }
 0x235   : > { %v1660_v8 = vpop.xlane.xlu0 %327 }
 0x236   : > { %vm333_vm2 = vcmp.eq.f32.partialorder %v1624_v50, %v1660_v8 }
 0x237   : > { %v1665_v9 = vsel %vm333_vm2, %v1621_v45, 128  ;;  %v1667_v10 = vpop.xlane.xlu1 %329 }
 0x238   : > { %vm334_vm3 = vcmp.eq.f32.partialorder %v1626_v55, %v1667_v10  ;;  %v368_v11 = vshra.s32 %v1665_v9, 16  ;;  %v367_v1 = vand.u32 65535, %v1665_v9 }
 0x239   : > { %v1673_v12 = vsel %vm334_vm3, %v1621_v45, 128  ;;  %v1675_v13 = vpop.xlane.xlu0 %606 }
 0x23a   : > { %vm612_vm4 = vcmp.eq.f32.partialorder %v1629_v58, %v1675_v13  ;;  %v1679_v14 = vcvt.s32.f32 %v368_v11  ;;  %v382_v15 = vshra.s32 %v1673_v12, 16  ;;  %v381_v3 = vand.u32 65535, %v1673_v12 }
 0x23b   : > { %v1683_v16 = vsel %vm612_vm4, %v1621_v45, 128  ;;  %v1685_v17 = vpop.xlane.xlu1 %608  ;;  %v369_v11 = vcvt.s32.f32 %v367_v1 }
 0x23c   : > { %vm613_vm5 = vcmp.eq.f32.partialorder %v1632_v59, %v1685_v17  ;;  %371 = vmin.xlane.f32.xlu0 %v1679_v14  ;;  %v1690_v18 = vcvt.s32.f32 %v382_v15  ;;  %v647_v19 = vshra.s32 %v1683_v16, 16  ;;  %v646_v15 = vand.u32 65535, %v1683_v16 }
 0x23d   : > { %v1694_v20 = vsel %vm613_vm5, %v1621_v45, 128  ;;  %v1696_v21 = vpop.xlane.xlu0 %323 }
 0x23e   : > { %vm331_vm6 = vcmp.eq.f32.partialorder %v1635_v60, %v1696_v21  ;;  %385 = vmin.xlane.f32.xlu1 %v1690_v18  ;;  %v1701_v22 = vcvt.s32.f32 %v647_v19  ;;  %v661_v23 = vshra.s32 %v1694_v20, 16 }
 0x23f   : > { %v1705_v24 = vsel %vm331_vm6, %v1621_v45, 128  ;;  %v1707_v25 = vpop.xlane.xlu1 %325 }
 0x240   : > { %vm332_vm7 = vcmp.eq.f32.partialorder %v1638_v61, %v1707_v25  ;;  %650 = vmin.xlane.f32.xlu0 %v1701_v22  ;;  %v1712_v26 = vcvt.s32.f32 %v661_v23  ;;  %v340_v27 = vshra.s32 %v1705_v24, 16 }
 0x241   : > { %v1716_v28 = vsel %vm332_vm7, %v1621_v45, 128  ;;  %v1718_v29 = vpop.xlane.xlu0 %602 }
 0x242   : > { %vm610_vm8 = vcmp.eq.f32.partialorder %v1641_v62, %v1718_v29  ;;  %664 = vmin.xlane.f32.xlu1 %v1712_v26  ;;  %v1723_v30 = vcvt.s32.f32 %v340_v27  ;;  %v354_v31 = vshra.s32 %v1716_v28, 16  ;;  %v383_v27 = vcvt.s32.f32 %v381_v3 }
 0x243   : > { %v1727_v32 = vsel %vm610_vm8, %v1621_v45, 128  ;;  %v1729_v33 = vpop.xlane.xlu1 %604 }
 0x244   : > { %vm611_vm9 = vcmp.eq.f32.partialorder %v1644_v63, %v1729_v33  ;;  %343 = vmin.xlane.f32.xlu0 %v1723_v30  ;;  %v1734_v34 = vcvt.s32.f32 %v354_v31  ;;  %v619_v35 = vshra.s32 %v1727_v32, 16  ;;  %v660_v31 = vand.u32 65535, %v1694_v20 }
 0x245   : > { %v1738_v36 = vsel %vm611_vm9, %v1621_v45, 128  ;;  %v353_v20 = vand.u32 65535, %v1716_v28 }
 0x246   : > { %v1740_v37 = vpop.xlane.xlu0 %881  ;;  %357 = vmin.xlane.f32.xlu1 %v1734_v34  ;;  %v1743_v38 = vcvt.s32.f32 %v619_v35  ;;  %v633_v39 = vshra.s32 %v1738_v36, 16  ;;  %v648_v35 = vcvt.s32.f32 %v646_v15  ;;  %v632_v28 = vand.u32 65535, %v1738_v36 }
 0x247   : > { %vm889_vm10 = vcmp.eq.f32.partialorder %v1648_v2, %v1740_v37  ;;  %v355_v1 = vcvt.s32.f32 %v353_v20 }
 0x248   : > { %v1749_v40 = vsel %vm889_vm10, %v1621_v45, 128  ;;  %v1751_v41 = vpop.xlane.xlu1 %883  ;;  %622 = vmin.xlane.f32.xlu0 %v1743_v38  ;;  %v1754_v42 = vcvt.s32.f32 %v633_v39  ;;  %v339_v39 = vand.u32 65535, %v1705_v24  ;;  %v618_v24 = vand.u32 65535, %v1727_v32 }
 0x249   : > { %2259 = vst [vmem:[#allocation7_spill] sm:$0xff] %v1751_v41  ;;  %vm890_vm11 = vcmp.eq.f32.partialorder %v1650_v5, %v1751_v41  ;;  %v898_v43 = vshra.s32 %v1749_v40, 16 }
 0x24a   : > { %v1760_v44 = vsel %vm890_vm11, %v1621_v45, 128  ;;  %v1762_v46 = vpop.xlane.xlu0 %885  ;;  %636 = vmin.xlane.f32.xlu1 %v1754_v42 }
 0x24b   : > { %2260 = vst [vmem:[#allocation8_spill] sm:$0xff] %v1762_v46  ;;  %vm891_vm12 = vcmp.eq.f32.partialorder %v1653_v6, %v1762_v46  ;;  %v1767_v47 = vcvt.s32.f32 %v898_v43  ;;  %v912_v48 = vshra.s32 %v1760_v44, 16  ;;  %v662_v43 = vcvt.s32.f32 %v660_v31 }
 0x24c   : > { %v1771_v49 = vsel %vm891_vm12, %v1621_v45, 128  ;;  %v1773_v51 = vpop.xlane.xlu1 %887 }
 0x24d   : > { %2261 = vst [vmem:[#allocation9_spill] sm:$0xff] %v1773_v51  ;;  %vm892_vm13 = vcmp.eq.f32.partialorder %v1656_v7, %v1773_v51  ;;  %901 = vmin.xlane.f32.xlu0 %v1767_v47  ;;  %v1778_v52 = vcvt.s32.f32 %v912_v48  ;;  %v926_v53 = vshra.s32 %v1771_v49, 16 }
 0x24e   : > { %v1782_v54 = vsel %vm892_vm13, %v1621_v45, 128 }
 0x24f   : > { %915 = vmin.xlane.f32.xlu1 %v1778_v52  ;;  %v1785_v56 = vcvt.s32.f32 %v926_v53  ;;  %v940_v57 = vshra.s32 %v1782_v54, 16  ;;  %v341_v53 = vcvt.s32.f32 %v339_v39  ;;  %v939_v39 = vand.u32 65535, %v1782_v54 }
 0x251   : > { %929 = vmin.xlane.f32.xlu0 %v1785_v56  ;;  %v1789_v0 = vcvt.s32.f32 %v940_v57 }
 0x253   : > { %943 = vmin.xlane.f32.xlu1 %v1789_v0 }
 0x2c9   : > { %v1794_v4 = vpop.xlane.xlu0 %371 }
 0x2ca   : > { %vm373_vm14 = vcmp.eq.f32.partialorder %v1679_v14, %v1794_v4 }
 0x2cb   : > { %v1799_v19 = vpop.xlane.xlu1 %385  ;;  %v374_v23 = vsel %vm373_vm14, %v369_v11, inf  ;;  %v620_v11 = vcvt.s32.f32 %v618_v24 }
 0x2cc   : > { %375 = vmin.xlane.f32.xlu0 %v374_v23  ;;  %vm387_vm15 = vcmp.eq.f32.partialorder %v1690_v18, %v1799_v19  ;;  %v634_v23 = vcvt.s32.f32 %v632_v28  ;;  %v392_v20 = vcvt.f32.s32 %v1799_v19 }
 0x2cd   : > { %v1804_v9 = vpop.xlane.xlu0 %650  ;;  %v388_v12 = vsel %vm387_vm15, %v383_v27, inf }
 0x2ce   : > { %389 = vmin.xlane.f32.xlu1 %v388_v12  ;;  %vm652_vm0 = vcmp.eq.f32.partialorder %v1701_v22, %v1804_v9  ;;  %v925_v12 = vand.u32 65535, %v1771_v49  ;;  %v657_v24 = vcvt.f32.s32 %v1804_v9  ;;  %v393_v28 = vshll.u32 %v392_v20, 16 }
 0x2cf   : > { %v1809_v14 = vpop.xlane.xlu1 %664  ;;  %v653_v16 = vsel %vm652_vm0, %v648_v35, inf }
 0x2d0   : > { %654 = vmin.xlane.f32.xlu0 %v653_v16  ;;  %vm666_vm1 = vcmp.eq.f32.partialorder %v1712_v26, %v1809_v14  ;;  %v927_v16 = vcvt.s32.f32 %v925_v12 }
 0x2d1   : > { %v1814_v18 = vpop.xlane.xlu0 %343  ;;  %v667_v48 = vsel %vm666_vm1, %v662_v43, inf  ;;  %v941_v43 = vcvt.s32.f32 %v939_v39 }
 0x2d2   : > { %668 = vmin.xlane.f32.xlu1 %v667_v48  ;;  %vm345_vm2 = vcmp.eq.f32.partialorder %v1723_v30, %v1814_v18  ;;  %v897_v30 = vand.u32 65535, %v1749_v40 }
 0x2d3   : > { %v1819_v22 = vpop.xlane.xlu1 %357  ;;  %v346_v57 = vsel %vm345_vm2, %v341_v53, inf }
 0x2d4   : > { %347 = vmin.xlane.f32.xlu0 %v346_v57  ;;  %vm359_vm3 = vcmp.eq.f32.partialorder %v1734_v34, %v1819_v22  ;;  %v911_v34 = vand.u32 65535, %v1760_v44  ;;  %v899_v31 = vcvt.s32.f32 %v897_v30  ;;  %v350_v30 = vcvt.f32.s32 %v1814_v18 }
 0x2d5   : > { %v1824_v26 = vpop.xlane.xlu0 %622  ;;  %v360_v3 = vsel %vm359_vm3, %v355_v1, inf  ;;  %v364_v9 = vcvt.f32.s32 %v1819_v22 }
 0x2d6   : > { %361 = vmin.xlane.f32.xlu1 %v360_v3  ;;  %vm624_vm4 = vcmp.eq.f32.partialorder %v1743_v38, %v1824_v26  ;;  %v913_v35 = vcvt.s32.f32 %v911_v34  ;;  %v351_v18 = vshll.u32 %v350_v30, 16 }
 0x2d7   : > { %v1829_v32 = vpop.xlane.xlu1 %636  ;;  %v625_v15 = vsel %vm624_vm4, %v620_v11, inf }
 0x2d8   : > { %626 = vmin.xlane.f32.xlu0 %v625_v15  ;;  %vm638_vm5 = vcmp.eq.f32.partialorder %v1754_v42, %v1829_v32  ;;  %v658_v15 = vshll.u32 %v657_v24, 16 }
 0x2d9   : > { %v639_v36 = vsel %vm638_vm5, %v634_v23, inf }
 0x2da   : > { %v1834_v27 = vpop.xlane.xlu0 %901  ;;  %640 = vmin.xlane.f32.xlu1 %v639_v36 }
 0x2db   : > { %vm903_vm6 = vcmp.eq.f32.partialorder %v1767_v47, %v1834_v27 }
 0x2dc   : > { %v1839_v38 = vpop.xlane.xlu1 %915  ;;  %v904_v40 = vsel %vm903_vm6, %v899_v31, inf }
 0x2dd   : > { %905 = vmin.xlane.f32.xlu0 %v904_v40  ;;  %vm917_vm7 = vcmp.eq.f32.partialorder %v1778_v52, %v1839_v38  ;;  %v378_v52 = vcvt.f32.s32 %v1794_v4 }
 0x2de   : > { %v1844_v42 = vpop.xlane.xlu0 %929  ;;  %v918_v44 = vsel %vm917_vm7, %v913_v35, inf  ;;  %v629_v35 = vcvt.f32.s32 %v1824_v26 }
 0x2df   : > { %919 = vmin.xlane.f32.xlu1 %v918_v44  ;;  %vm931_vm8 = vcmp.eq.f32.partialorder %v1785_v56, %v1844_v42  ;;  %v379_v53 = vshll.u32 %v378_v52, 16  ;;  %v671_v56 = vcvt.f32.s32 %v1809_v14 }
 0x2e0   : > { %v1848_v49 = vpop.xlane.xlu1 %943  ;;  %v932_v47 = vsel %vm931_vm8, %v927_v16, inf  ;;  %v630_v52 = vshll.u32 %v629_v35, 16 }
 0x2e1   : > { %933 = vmin.xlane.f32.xlu0 %v932_v47  ;;  %vm945_vm9 = vcmp.eq.f32.partialorder %v1789_v0, %v1848_v49  ;;  %v672_v4 = vshll.u32 %v671_v56, 16  ;;  %v365_v47 = vshll.u32 %v364_v9, 16 }
 0x2e2   : > { %v946_v54 = vsel %vm945_vm9, %v941_v43, inf }
 0x2e3   : > { %947 = vmin.xlane.f32.xlu1 %v946_v54 }
 0x359   : > { %v376_v48 = vpop.xlane.xlu0 %375 }
 0x35a   : > { %v377_v57 = vcvt.f32.s32 %v376_v48 }
 0x35b   : > { %v390_v1 = vpop.xlane.xlu1 %389 }
 0x35c   : > { %v380_v3 = vadd.s32 %v379_v53, %v377_v57  ;;  %v391_v11 = vcvt.f32.s32 %v390_v1  ;;  %v922_v57 = vcvt.f32.s32 %v1839_v38 }
 0x35d   : > { %v655_v0 = vpop.xlane.xlu0 %654 }
 0x35e   : > { %v394_v23 = vadd.s32 %v393_v28, %v391_v11  ;;  %v656_v34 = vcvt.f32.s32 %v655_v0  ;;  %vm401_vm10 = vcmp.eq.s32.totalorder %v1621_v45, %v380_v3  ;;  %v923_v30 = vshll.u32 %v922_v57, 16 }
 0x35f   : > { %v669_v19 = vpop.xlane.xlu1 %668  ;;  %v1859_v36 = vsel %vm401_vm10, -inf, %v1624_v50  ;;  %v643_v50 = vcvt.f32.s32 %v1829_v32  ;;  %v908_v32 = vcvt.f32.s32 %v1834_v27 }
 0x360   : > { %v659_v14 = vadd.s32 %v658_v15, %v656_v34  ;;  %v670_v31 = vcvt.f32.s32 %v669_v19  ;;  %411 = vmax.xlane.f32.xlu0 %v1859_v36  ;;  %vm402_vm11 = vcmp.eq.s32.totalorder %v1621_v45, %v394_v23 }
 0x361   : > { %v348_v12 = vpop.xlane.xlu0 %347  ;;  %v1865_v40 = vsel %vm402_vm11, -inf, %v1626_v55  ;;  %v909_v27 = vshll.u32 %v908_v32, 16 }
 0x362   : > { %v673_v39 = vadd.s32 %v672_v4, %v670_v31  ;;  %v349_v44 = vcvt.f32.s32 %v348_v12  ;;  %413 = vmax.xlane.f32.xlu1 %v1865_v40  ;;  %vm680_vm12 = vcmp.eq.s32.totalorder %v1621_v45, %v659_v14 }
 0x363   : > { %v362_v22 = vpop.xlane.xlu1 %361  ;;  %v1872_v16 = vsel %vm680_vm12, -inf, %v1629_v58  ;;  %v644_v58 = vshll.u32 %v643_v50, 16 }
 0x364   : > { %v352_v43 = vadd.s32 %v351_v18, %v349_v44  ;;  %v363_v54 = vcvt.f32.s32 %v362_v22  ;;  %690 = vmax.xlane.f32.xlu0 %v1872_v16  ;;  %vm681_vm13 = vcmp.eq.s32.totalorder %v1621_v45, %v673_v39 }
 0x365   : > { %v627_v55 = vpop.xlane.xlu0 %626  ;;  %v1877_v26 = vsel %vm681_vm13, -inf, %v1632_v59 }
 0x366   : > { %v366_v20 = vadd.s32 %v365_v47, %v363_v54  ;;  %v628_v48 = vcvt.f32.s32 %v627_v55  ;;  %692 = vmax.xlane.f32.xlu1 %v1877_v26  ;;  %vm399_vm14 = vcmp.eq.s32.totalorder %v1621_v45, %v352_v43 }
 0x367   : > { %v641_v53 = vpop.xlane.xlu1 %640  ;;  %v1883_v24 = vsel %vm399_vm14, -inf, %v1635_v60  ;;  %v936_v60 = vcvt.f32.s32 %v1844_v42 }
 0x368   : > { %v631_v56 = vadd.s32 %v630_v52, %v628_v48  ;;  %v642_v1 = vcvt.f32.s32 %v641_v53  ;;  %407 = vmax.xlane.f32.xlu0 %v1883_v24  ;;  %vm400_vm15 = vcmp.eq.s32.totalorder %v1621_v45, %v366_v20 }
 0x369   : > { %v1889_v59 = vsel %vm400_vm15, -inf, %v1638_v61  ;;  %v950_v61 = vcvt.f32.s32 %v1848_v49  ;;  %v937_v42 = vshll.u32 %v936_v60, 16 }
 0x36a   : > { %v645_v28 = vadd.s32 %v644_v58, %v642_v1  ;;  %v906_v3 = vpop.xlane.xlu0 %905  ;;  %409 = vmax.xlane.f32.xlu1 %v1889_v59  ;;  %vm678_vm0 = vcmp.eq.s32.totalorder %v1621_v45, %v631_v56 }
 0x36b   : > { %v907_v11 = vcvt.f32.s32 %v906_v3  ;;  %v1895_v38 = vsel %vm678_vm0, -inf, %v1641_v62  ;;  %v951_v31 = vshll.u32 %v950_v61, 16 }
 0x36c   : > { %v920_v0 = vpop.xlane.xlu1 %919  ;;  %686 = vmax.xlane.f32.xlu0 %v1895_v38  ;;  %vm679_vm1 = vcmp.eq.s32.totalorder %v1621_v45, %v645_v28 }
 0x36d   : > { %v910_v15 = vadd.s32 %v909_v27, %v907_v11  ;;  %v921_v23 = vcvt.f32.s32 %v920_v0  ;;  %v1901_v34 = vsel %vm679_vm1, -inf, %v1644_v63 }
 0x36e   : > { %v934_v4 = vpop.xlane.xlu0 %933  ;;  %688 = vmax.xlane.f32.xlu1 %v1901_v34 }
 0x36f   : > { %v924_v19 = vadd.s32 %v923_v30, %v921_v23  ;;  %v935_v62 = vcvt.f32.s32 %v934_v4  ;;  %vm957_vm2 = vcmp.eq.s32.totalorder %v1621_v45, %v910_v15 }
 0x370   : > { %v948_v9 = vpop.xlane.xlu1 %947  ;;  %v1906_v14 = vsel %vm957_vm2, -inf, %v1648_v2 }
 0x371   : > { %v938_v18 = vadd.s32 %v937_v42, %v935_v62  ;;  %v949_v49 = vcvt.f32.s32 %v948_v9  ;;  %965 = vmax.xlane.f32.xlu0 %v1906_v14  ;;  %vm958_vm3 = vcmp.eq.s32.totalorder %v1621_v45, %v924_v19 }
 0x372   : > { %v1911_v63 = vsel %vm958_vm3, -inf, %v1650_v5 }
 0x373   : > { %v952_v12 = vadd.s32 %v951_v31, %v949_v49  ;;  %967 = vmax.xlane.f32.xlu1 %v1911_v63  ;;  %vm959_vm4 = vcmp.eq.s32.totalorder %v1621_v45, %v938_v18 }
 0x374   : > { %v1916_v35 = vsel %vm959_vm4, -inf, %v1653_v6 }
 0x375   : > { %969 = vmax.xlane.f32.xlu0 %v1916_v35  ;;  %vm960_vm5 = vcmp.eq.s32.totalorder %v1621_v45, %v952_v12 }
 0x376   : > { %v1921_v2 = vsel %vm960_vm5, -inf, %v1656_v7 }
 0x377   : > { %971 = vmax.xlane.f32.xlu1 %v1921_v2 }
 0x3ed   : > { %v1924_v39 = vpop.xlane.xlu0 %411 }
 0x3ee   : > { %vm417_vm6 = vcmp.eq.f32.partialorder %v1859_v36, %v1924_v39 }
 0x3ef   : > { %v1929_v5 = vsel %vm417_vm6, %v1621_v45, 128  ;;  %v1931_v44 = vpop.xlane.xlu1 %413 }
 0x3f0   : > { %vm418_vm7 = vcmp.eq.f32.partialorder %v1865_v40, %v1931_v44  ;;  %v452_v6 = vshra.s32 %v1929_v5, 16 }
 0x3f1   : > { %v1937_v7 = vsel %vm418_vm7, %v1621_v45, 128  ;;  %v1939_v50 = vpop.xlane.xlu0 %690 }
 0x3f2   : > { %vm696_vm8 = vcmp.eq.f32.partialorder %v1872_v16, %v1939_v50  ;;  %v1943_v22 = vcvt.s32.f32 %v452_v6  ;;  %v466_v47 = vshra.s32 %v1937_v7, 16 }
 0x3f3   : > { %v1947_v43 = vsel %vm696_vm8, %v1621_v45, 128  ;;  %v1949_v54 = vpop.xlane.xlu1 %692 }
 0x3f4   : > { %vm697_vm9 = vcmp.eq.f32.partialorder %v1877_v26, %v1949_v54  ;;  %455 = vmin.xlane.f32.xlu0 %v1943_v22  ;;  %v1954_v55 = vcvt.s32.f32 %v466_v47  ;;  %v731_v52 = vshra.s32 %v1947_v43, 16  ;;  %v730_v46 = vand.u32 65535, %v1947_v43 }
 0x3f5   : > { %v1958_v20 = vsel %vm697_vm9, %v1621_v45, 128  ;;  %v1960_v48 = vpop.xlane.xlu0 %407 }
 0x3f6   : > { %vm415_vm10 = vcmp.eq.f32.partialorder %v1883_v24, %v1960_v48  ;;  %469 = vmin.xlane.f32.xlu1 %v1954_v55  ;;  %v1965_v58 = vcvt.s32.f32 %v731_v52  ;;  %v745_v32 = vshra.s32 %v1958_v20, 16 }
 0x3f7   : > { %v1969_v53 = vsel %vm415_vm10, %v1621_v45, 128  ;;  %v1971_v57 = vpop.xlane.xlu1 %409 }
 0x3f8   : > { %vm416_vm11 = vcmp.eq.f32.partialorder %v1889_v59, %v1971_v57  ;;  %734 = vmin.xlane.f32.xlu0 %v1965_v58  ;;  %v1976_v56 = vcvt.s32.f32 %v745_v32  ;;  %v424_v1 = vshra.s32 %v1969_v53, 16 }
 0x3f9   : > { %v1980_v28 = vsel %vm416_vm11, %v1621_v45, 128  ;;  %v1982_v3 = vpop.xlane.xlu0 %686 }
 0x3fa   : > { %vm694_vm12 = vcmp.eq.f32.partialorder %v1895_v38, %v1982_v3  ;;  %748 = vmin.xlane.f32.xlu1 %v1976_v56  ;;  %v1987_v27 = vcvt.s32.f32 %v424_v1  ;;  %v438_v60 = vshra.s32 %v1980_v28, 16 }
 0x3fb   : > { %v1991_v11 = vsel %vm694_vm12, %v1621_v45, 128  ;;  %v1993_v30 = vpop.xlane.xlu1 %688 }
 0x3fc   : > { %vm695_vm13 = vcmp.eq.f32.partialorder %v1901_v34, %v1993_v30  ;;  %427 = vmin.xlane.f32.xlu0 %v1987_v27  ;;  %v1998_v0 = vcvt.s32.f32 %v438_v60  ;;  %v703_v61 = vshra.s32 %v1991_v11, 16 }
 0x3fd   : > { %v2002_v15 = vsel %vm695_vm13, %v1621_v45, 128 }
 0x3fe   : > { %v2004_v23 = vpop.xlane.xlu0 %965  ;;  %441 = vmin.xlane.f32.xlu1 %v1998_v0  ;;  %v2007_v4 = vcvt.s32.f32 %v703_v61  ;;  %v717_v42 = vshra.s32 %v2002_v15, 16 }
 0x3ff   : > { %2262 = vst [vmem:[#allocation10_spill] sm:$0xff] %v2004_v23  ;;  %vm973_vm14 = vcmp.eq.f32.partialorder %v1906_v14, %v2004_v23  ;;  %v732_v23 = vcvt.s32.f32 %v730_v46 }
 0x400   : > { %v2013_v19 = vsel %vm973_vm14, %v1621_v45, 128  ;;  %v2015_v62 = vpop.xlane.xlu1 %967  ;;  %706 = vmin.xlane.f32.xlu0 %v2007_v4  ;;  %v2018_v9 = vcvt.s32.f32 %v717_v42 }
 0x401   : > { %2263 = vst [vmem:[#allocation11_spill] sm:$0xff] %v2015_v62  ;;  %vm974_vm15 = vcmp.eq.f32.partialorder %v1911_v63, %v2015_v62  ;;  %v982_v31 = vshra.s32 %v2013_v19, 16 }
 0x402   : > { %v2024_v18 = vsel %vm974_vm15, %v1621_v45, 128  ;;  %v2026_v49 = vpop.xlane.xlu0 %969  ;;  %720 = vmin.xlane.f32.xlu1 %v2018_v9 }
 0x403   : > { %2264 = vst [vmem:[#allocation12_spill] sm:$0xff] %v2026_v49  ;;  %vm975_vm0 = vcmp.eq.f32.partialorder %v1916_v35, %v2026_v49  ;;  %v2031_v12 = vcvt.s32.f32 %v982_v31  ;;  %v996_v6 = vshra.s32 %v2024_v18, 16 }
 0x404   : > { %v2035_v47 = vsel %vm975_vm0, %v1621_v45, 128  ;;  %v2037_v52 = vpop.xlane.xlu1 %971 }
 0x405   : > { %2265 = vst [vmem:[#allocation13_spill] sm:$0xff] %v2037_v52  ;;  %vm976_vm1 = vcmp.eq.f32.partialorder %v1921_v2, %v2037_v52  ;;  %985 = vmin.xlane.f32.xlu0 %v2031_v12  ;;  %v2042_v32 = vcvt.s32.f32 %v996_v6  ;;  %v1010_v1 = vshra.s32 %v2035_v47, 16  ;;  %v451_v6 = vand.u32 65535, %v1929_v5 }
 0x406   : > { %v2046_v60 = vsel %vm976_vm1, %v1621_v45, 128  ;;  %v465_v52 = vand.u32 65535, %v1937_v7 }
 0x407   : > { %999 = vmin.xlane.f32.xlu1 %v2042_v32  ;;  %v2049_v61 = vcvt.s32.f32 %v1010_v1  ;;  %v1024_v42 = vshra.s32 %v2046_v60, 16  ;;  %v453_v49 = vcvt.s32.f32 %v451_v6  ;;  %v423_v6 = vand.u32 65535, %v1969_v53 }
 0x408   : > { %v467_v41 = vcvt.s32.f32 %v465_v52  ;;  %v702_v53 = vand.u32 65535, %v1991_v11 }
 0x409   : > { %1013 = vmin.xlane.f32.xlu0 %v2049_v61  ;;  %v2053_v31 = vcvt.s32.f32 %v1024_v42  ;;  %v744_v42 = vand.u32 65535, %v1958_v20  ;;  %v437_v20 = vand.u32 65535, %v1980_v28  ;;  %v425_v46 = vcvt.s32.f32 %v423_v6 }
 0x40a   : > { %v716_v28 = vand.u32 65535, %v2002_v15 }
 0x40b   : > { %1027 = vmin.xlane.f32.xlu1 %v2053_v31 }
 0x40c   : > { %v718_v6 = vcvt.s32.f32 %v716_v28 }
 0x481   : > { %v2058_v51 = vpop.xlane.xlu0 %455 }
 0x482   : > { %vm457_vm2 = vcmp.eq.f32.partialorder %v1943_v22, %v2058_v51 }
 0x483   : > { %v2063_v1 = vpop.xlane.xlu1 %469  ;;  %v458_v62 = vsel %vm457_vm2, %v453_v49, inf  ;;  %v746_v49 = vcvt.s32.f32 %v744_v42  ;;  %v704_v42 = vcvt.s32.f32 %v702_v53 }
 0x484   : > { %459 = vmin.xlane.f32.xlu0 %v458_v62  ;;  %vm471_vm3 = vcmp.eq.f32.partialorder %v1954_v55, %v2063_v1  ;;  %v439_v62 = vcvt.s32.f32 %v437_v20  ;;  %v1009_v20 = vand.u32 65535, %v2035_v47 }
 0x485   : > { %v2068_v5 = vpop.xlane.xlu0 %734  ;;  %v472_v7 = vsel %vm471_vm3, %v467_v41, inf }
 0x486   : > { %473 = vmin.xlane.f32.xlu1 %v472_v7  ;;  %vm736_vm4 = vcmp.eq.f32.partialorder %v1965_v58, %v2068_v5  ;;  %v1011_v53 = vcvt.s32.f32 %v1009_v20 }
 0x487   : > { %v2073_v22 = vpop.xlane.xlu1 %748  ;;  %v737_v43 = vsel %vm736_vm4, %v732_v23, inf }
 0x488   : > { %738 = vmin.xlane.f32.xlu0 %v737_v43  ;;  %vm750_vm5 = vcmp.eq.f32.partialorder %v1976_v56, %v2073_v22 }
 0x489   : > { %v2078_v55 = vpop.xlane.xlu0 %427  ;;  %v751_v41 = vsel %vm750_vm5, %v746_v49, inf }
 0x48a   : > { %752 = vmin.xlane.f32.xlu1 %v751_v41  ;;  %vm429_vm6 = vcmp.eq.f32.partialorder %v1987_v27, %v2078_v55  ;;  %v981_v27 = vand.u32 65535, %v2013_v19 }
 0x48b   : > { %v2083_v58 = vpop.xlane.xlu1 %441  ;;  %v430_v23 = vsel %vm429_vm6, %v425_v46, inf  ;;  %v1023_v46 = vand.u32 65535, %v2046_v60 }
 0x48c   : > { %431 = vmin.xlane.f32.xlu0 %v430_v23  ;;  %vm443_vm7 = vcmp.eq.f32.partialorder %v1998_v0, %v2083_v58  ;;  %v995_v0 = vand.u32 65535, %v2024_v18  ;;  %v983_v49 = vcvt.s32.f32 %v981_v27 }
 0x48d   : > { %v2088_v56 = vpop.xlane.xlu0 %706  ;;  %v444_v52 = vsel %vm443_vm7, %v439_v62, inf  ;;  %v1025_v23 = vcvt.s32.f32 %v1023_v46  ;;  %v476_v62 = vcvt.f32.s32 %v2063_v1 }
 0x48e   : > { %445 = vmin.xlane.f32.xlu1 %v444_v52  ;;  %vm708_vm8 = vcmp.eq.f32.partialorder %v2007_v4, %v2088_v56  ;;  %v997_v41 = vcvt.s32.f32 %v995_v0 }
 0x48f   : > { %v2093_v11 = vpop.xlane.xlu1 %720  ;;  %v709_v7 = vsel %vm708_vm8, %v704_v42, inf  ;;  %v741_v42 = vcvt.f32.s32 %v2068_v5  ;;  %v448_v5 = vcvt.f32.s32 %v2083_v58 }
 0x490   : > { %710 = vmin.xlane.f32.xlu0 %v709_v7  ;;  %vm722_vm9 = vcmp.eq.f32.partialorder %v2018_v9, %v2093_v11 }
 0x491   : > { %v723_v15 = vsel %vm722_vm9, %v718_v6, inf  ;;  %v477_v6 = vshll.u32 %v476_v62, 16  ;;  %v742_v20 = vshll.u32 %v741_v42, 16 }
 0x492   : > { %v2098_v43 = vpop.xlane.xlu0 %985  ;;  %724 = vmin.xlane.f32.xlu1 %v723_v15 }
 0x493   : > { %vm987_vm10 = vcmp.eq.f32.partialorder %v2031_v12, %v2098_v43 }
 0x494   : > { %v2103_v4 = vpop.xlane.xlu1 %999  ;;  %v988_v19 = vsel %vm987_vm10, %v983_v49, inf  ;;  %v434_v49 = vcvt.f32.s32 %v2078_v55  ;;  %vm507_vm10 = vcmask 7168  }
 0x495   : > { %989 = vmin.xlane.f32.xlu0 %v988_v19  ;;  %vm1001_vm11 = vcmp.eq.f32.partialorder %v2042_v32, %v2103_v4  ;;  %v462_v32 = vcvt.f32.s32 %v2058_v51 }
 0x496   : > { %v2108_v9 = vpop.xlane.xlu0 %1013  ;;  %v1002_v18 = vsel %vm1001_vm11, %v997_v41, inf  ;;  %vm786_vm11 = vcmask 15368  }
 0x497   : > { %1003 = vmin.xlane.f32.xlu1 %v1002_v18  ;;  %vm1015_vm12 = vcmp.eq.f32.partialorder %v2049_v61, %v2108_v9  ;;  %v463_v52 = vshll.u32 %v462_v32, 16  ;;  %v755_v61 = vcvt.f32.s32 %v2073_v22 }
 0x498   : > { %v2112_v47 = vpop.xlane.xlu1 %1027  ;;  %v1016_v12 = vsel %vm1015_vm12, %v1011_v53, inf  ;;  %v435_v53 = vshll.u32 %v434_v49, 16  ;;  %vm1065_vm12 = vcmask 23568  }
 0x499   : > { %1017 = vmin.xlane.f32.xlu0 %v1016_v12  ;;  %vm1029_vm13 = vcmp.eq.f32.partialorder %v2053_v31, %v2112_v47  ;;  %v756_v51 = vshll.u32 %v755_v61, 16 }
 0x49a   : > { %v1030_v60 = vsel %vm1029_vm13, %v1025_v23, inf  ;;  %v713_v23 = vcvt.f32.s32 %v2088_v56  ;;  %vm1074_vm13 = vcmask 23552  }
 0x49b   : > { %1031 = vmin.xlane.f32.xlu1 %v1030_v60 }
 0x49c   : > { %v714_v56 = vshll.u32 %v713_v23, 16 }
 0x511   : > { %v460_v28 = vpop.xlane.xlu0 %459 }
 0x512   : > { %v461_v27 = vcvt.f32.s32 %v460_v28  ;;  %v449_v28 = vshll.u32 %v448_v5, 16 }
 0x513   : > { %v474_v7 = vpop.xlane.xlu1 %473 }
 0x514   : > { %v464_v0 = vadd.s32 %v463_v52, %v461_v27  ;;  %v475_v15 = vcvt.f32.s32 %v474_v7 }
 0x515   : > { %v739_v31 = vpop.xlane.xlu0 %738 }
 0x516   : > { %v478_v19 = vadd.s32 %v477_v6, %v475_v15  ;;  %v740_v41 = vcvt.f32.s32 %v739_v31  ;;  %vm485_vm14 = vcmp.eq.s32.totalorder %v1621_v45, %v464_v0  ;;  %v1006_v15 = vcvt.f32.s32 %v2103_v4 }
 0x517   : > { %v753_v1 = vpop.xlane.xlu1 %752  ;;  %v489_v46 = vsel %vm485_vm14, -inf, %v1859_v36  ;;  %v727_v36 = vcvt.f32.s32 %v2093_v11  ;;  %v992_v11 = vcvt.f32.s32 %v2098_v43  ;;  %v1020_v43 = vcvt.f32.s32 %v2108_v9 }
 0x518   : > { %v743_v18 = vadd.s32 %v742_v20, %v740_v41  ;;  %v754_v22 = vcvt.f32.s32 %v753_v1  ;;  %495 = vmax.xlane.f32.xlu0 %v489_v46  ;;  %vm486_vm15 = vcmp.eq.s32.totalorder %v1621_v45, %v478_v19  ;;  %v1007_v1 = vshll.u32 %v1006_v15, 16 }
 0x519   : > { %v432_v12 = vpop.xlane.xlu0 %431  ;;  %v490_v55 = vsel %vm486_vm15, -inf, %v1865_v40  ;;  %v728_v6 = vshll.u32 %v727_v36, 16  ;;  %v993_v41 = vshll.u32 %v992_v11, 16  ;;  %v1034_v46 = vcvt.f32.s32 %v2112_v47 }
 0x51a   : > { %v757_v60 = vadd.s32 %v756_v51, %v754_v22  ;;  %v433_v32 = vcvt.f32.s32 %v432_v12  ;;  %497 = vmax.xlane.f32.xlu1 %v490_v55  ;;  %vm764_vm0 = vcmp.eq.s32.totalorder %v1621_v45, %v743_v18  ;;  %v759_v11 = vadd.f32 %v1993_v30, %v1729_v33 }
 0x51b   : > { %v446_v62 = vpop.xlane.xlu1 %445  ;;  %v768_v58 = vsel %vm764_vm0, -inf, %v1872_v16  ;;  %v1035_v23 = vshll.u32 %v1034_v46, 16  ;;  %v2271_v46 = vld [vmem:[#allocation9_spill] sm:$0xff]  ;;  %vm1095_vm14 = vcmask 1041409   ;;  %vm1098_vm15 = vcmask 17408  }
 0x51c   : > { %v436_v52 = vadd.s32 %v435_v53, %v433_v32  ;;  %v447_v42 = vcvt.f32.s32 %v446_v62  ;;  %774 = vmax.xlane.f32.xlu0 %v768_v58  ;;  %vm765_vm1 = vcmp.eq.s32.totalorder %v1621_v45, %v757_v60  ;;  %v1021_v53 = vshll.u32 %v1020_v43, 16  ;;  %v2270_v43 = vld [vmem:[#allocation12_spill] sm:$0xff] }
 0x51d   : > { %v711_v27 = vpop.xlane.xlu0 %710  ;;  %v769_v40 = vsel %vm765_vm1, -inf, %v1877_v26 }
 0x51e   : > { %v450_v61 = vadd.s32 %v449_v28, %v447_v42  ;;  %v712_v7 = vcvt.f32.s32 %v711_v27  ;;  %776 = vmax.xlane.f32.xlu1 %v769_v40  ;;  %vm483_vm2 = vcmp.eq.s32.totalorder %v1621_v45, %v436_v52  ;;  %v482_v28 = vadd.f32 %v1931_v44, %v1667_v10 }
 0x51f   : > { %v725_v0 = vpop.xlane.xlu1 %724  ;;  %v487_v16 = vsel %vm483_vm2, -inf, %v1883_v24  ;;  %v760_v42 = vadd.f32 %v1939_v50, %v1675_v13  ;;  %v479_v10 = vadd.f32 %v1960_v48, %v1696_v21  ;;  %v480_v50 = vadd.f32 %v1971_v57, %v1707_v25 }
 0x520   : > { %v715_v49 = vadd.s32 %v714_v56, %v712_v7  ;;  %v726_v31 = vcvt.f32.s32 %v725_v0  ;;  %491 = vmax.xlane.f32.xlu0 %v487_v16  ;;  %vm484_vm3 = vcmp.eq.s32.totalorder %v1621_v45, %v450_v61  ;;  %v758_v7 = vadd.f32 %v1982_v3, %v1718_v29 }
 0x521   : > { %v488_v26 = vsel %vm484_vm3, -inf, %v1889_v59 }
 0x522   : > { %v729_v20 = vadd.s32 %v728_v6, %v726_v31  ;;  %v990_v19 = vpop.xlane.xlu0 %989  ;;  %493 = vmax.xlane.f32.xlu1 %v488_v26  ;;  %vm762_vm4 = vcmp.eq.s32.totalorder %v1621_v45, %v715_v49  ;;  %v2266_v49 = vld [vmem:[#allocation10_spill] sm:$0xff]  ;;  %v2267_v26 = vld [vmem:[#allocation7_spill] sm:$0xff] }
 0x523   : > { %v991_v51 = vcvt.f32.s32 %v990_v19  ;;  %v766_v24 = vsel %vm762_vm4, -inf, %v1895_v38  ;;  %v1037_v29 = vadd.f32 %v2266_v49, %v1740_v37  ;;  %v2272_v37 = vld [vmem:[#allocation13_spill] sm:$0xff] }
 0x524   : > { %v1004_v4 = vpop.xlane.xlu1 %1003  ;;  %770 = vmax.xlane.f32.xlu0 %v766_v24  ;;  %vm763_vm5 = vcmp.eq.s32.totalorder %v1621_v45, %v729_v20  ;;  %v2268_v20 = vld [vmem:[#allocation11_spill] sm:$0xff] }
 0x525   : > { %v994_v5 = vadd.s32 %v993_v41, %v991_v51  ;;  %v1005_v59 = vcvt.f32.s32 %v1004_v4  ;;  %v767_v18 = vsel %vm763_vm5, -inf, %v1901_v34  ;;  %v1038_v19 = vadd.f32 %v2268_v20, %v2267_v26  ;;  %v2269_v41 = vld [vmem:[#allocation8_spill] sm:$0xff] }
 0x526   : > { %v1018_v22 = vpop.xlane.xlu0 %1017  ;;  %772 = vmax.xlane.f32.xlu1 %v767_v18  ;;  %v1039_v51 = vadd.f32 %v2270_v43, %v2269_v41 }
 0x527   : > { %v1008_v12 = vadd.s32 %v1007_v1, %v1005_v59  ;;  %v1019_v55 = vcvt.f32.s32 %v1018_v22  ;;  %vm1041_vm6 = vcmp.eq.s32.totalorder %v1621_v45, %v994_v5  ;;  %v1040_v5 = vadd.f32 %v2272_v37, %v2271_v46 }
 0x528   : > { %v1032_v9 = vpop.xlane.xlu1 %1031  ;;  %v1045_v38 = vsel %vm1041_vm6, -inf, %v1906_v14  ;;  %v481_v14 = vadd.f32 %v1924_v39, %v1660_v8 }
 0x529   : > { %v1022_v60 = vadd.s32 %v1021_v53, %v1019_v55  ;;  %v1033_v32 = vcvt.f32.s32 %v1032_v9  ;;  %1049 = vmax.xlane.f32.xlu0 %v1045_v38  ;;  %vm1042_vm7 = vcmp.eq.s32.totalorder %v1621_v45, %v1008_v12 }
 0x52a   : > { %v1046_v47 = vsel %vm1042_vm7, -inf, %v1911_v63 }
 0x52b   : > { %v1036_v36 = vadd.s32 %v1035_v23, %v1033_v32  ;;  %1051 = vmax.xlane.f32.xlu1 %v1046_v47  ;;  %vm1043_vm8 = vcmp.eq.s32.totalorder %v1621_v45, %v1022_v60 }
 0x52c   : > { %v1047_v34 = vsel %vm1043_vm8, -inf, %v1916_v35 }
 0x52d   : > { %1053 = vmax.xlane.f32.xlu0 %v1047_v34  ;;  %vm1044_vm9 = vcmp.eq.s32.totalorder %v1621_v45, %v1036_v36  ;;  %v761_v45 = vadd.f32 %v1949_v54, %v1685_v17 }
 0x52e   : > { %v1048_v62 = vsel %vm1044_vm9, -inf, %v1921_v2 }
 0x52f   : > { %1055 = vmax.xlane.f32.xlu1 %v1048_v62 }
 0x5a5   : > { %v496_v58 = vpop.xlane.xlu0 %495 }
 0x5a6   : > { %v501_v63 = vadd.f32 %v496_v58, %v481_v14 }
 0x5a7   : > { %v498_v52 = vpop.xlane.xlu1 %497 }
 0x5a8   : > { %v505_v35 = vmul.f32 0.33333334, %v501_v63  ;;  %v502_v27 = vadd.f32 %v498_v52, %v482_v28 }
 0x5a9   : > { %v775_v40 = vpop.xlane.xlu0 %774 }
 0x5aa   : > { %510 = vst.msk [vmem:[#allocation3 + $0x10] sm:$0xff] %vm507_vm10, %v505_v35  ;;  %v506_v2 = vmul.f32 0.33333334, %v502_v27  ;;  %v780_v8 = vadd.f32 %v775_v40, %v760_v42 }
 0x5ab   : > { %v777_v39 = vpop.xlane.xlu1 %776 }
 0x5ac   : > { %511 = vst.msk [vmem:[#allocation3 + $0x18] sm:$0xff] %vm507_vm10, %v506_v2  ;;  %v784_v44 = vmul.f32 0.33333334, %v780_v8  ;;  %v781_v56 = vadd.f32 %v777_v39, %v761_v45 }
 0x5ad   : > { %v492_v13 = vpop.xlane.xlu0 %491 }
 0x5ae   : > { %789 = vst.msk [vmem:[#allocation3 + $0x10] sm:$0xff] %vm786_vm11, %v784_v44  ;;  %v785_v17 = vmul.f32 0.33333334, %v781_v56  ;;  %v499_v54 = vadd.f32 %v492_v13, %v479_v10 }
 0x5af   : > { %v494_v61 = vpop.xlane.xlu1 %493 }
 0x5b0   : > { %790 = vst.msk [vmem:[#allocation3 + $0x18] sm:$0xff] %vm786_vm11, %v785_v17  ;;  %v503_v6 = vmul.f32 0.33333334, %v499_v54  ;;  %v500_v21 = vadd.f32 %v494_v61, %v480_v50 }
 0x5b1   : > { %v771_v48 = vpop.xlane.xlu0 %770 }
 0x5b2   : > { %508 = vst.msk [vmem:[#allocation3] sm:$0xff] %vm507_vm10, %v503_v6  ;;  %v504_v0 = vmul.f32 0.33333334, %v500_v21  ;;  %v778_v25 = vadd.f32 %v771_v48, %v758_v7 }
 0x5b3   : > { %v773_v57 = vpop.xlane.xlu1 %772 }
 0x5b4   : > { %509 = vst.msk [vmem:[#allocation3 + $0x8] sm:$0xff] %vm507_vm10, %v504_v0  ;;  %v782_v16 = vmul.f32 0.33333334, %v778_v25  ;;  %v779_v15 = vadd.f32 %v773_v57, %v759_v11 }
 0x5b6   : > { %787 = vst.msk [vmem:[#allocation3] sm:$0xff] %vm786_vm11, %v782_v16  ;;  %v783_v3 = vmul.f32 0.33333334, %v779_v15  ;;  %v1050_v31 = vpop.xlane.xlu0 %1049 }
 0x5b7   : > { %v1057_v33 = vadd.f32 %v1050_v31, %v1037_v29 }
 0x5b8   : > { %788 = vst.msk [vmem:[#allocation3 + $0x8] sm:$0xff] %vm786_vm11, %v783_v3  ;;  %v1052_v30 = vpop.xlane.xlu1 %1051 }
 0x5b9   : > { %v1061_v24 = vmul.f32 0.33333334, %v1057_v33  ;;  %v1058_v1 = vadd.f32 %v1052_v30, %v1038_v19 }
 0x5ba   : > { %v1054_v4 = vpop.xlane.xlu0 %1053 }
 0x5bb   : > { %1066 = vst.msk [vmem:[#allocation3] sm:$0xff] %vm1065_vm12, %v1061_v24  ;;  %v1062_v59 = vmul.f32 0.33333334, %v1058_v1  ;;  %v1059_v18 = vadd.f32 %v1054_v4, %v1039_v51 }
 0x5bc   : > { %v1056_v22 = vpop.xlane.xlu1 %1055 }
 0x5bd   : > { %1067 = vst.msk [vmem:[#allocation3 + $0x8] sm:$0xff] %vm1065_vm12, %v1062_v59  ;;  %v1063_v53 = vmul.f32 0.33333334, %v1059_v18  ;;  %v1060_v12 = vadd.f32 %v1056_v22, %v1040_v5 }
 0x5bf   : > { %1068 = vst.msk [vmem:[#allocation3 + $0x10] sm:$0xff] %vm1065_vm12, %v1063_v53  ;;  %v1064_v55 = vmul.f32 0.33333334, %v1060_v12 }
 0x5c1   : > { %1069 = vst.msk [vmem:[#allocation3 + $0x18] sm:$0xff] %vm1065_vm12, %v1064_v55 }
 0x5c2   : > { %v1070_v9 = vld [vmem:[#allocation3] sm:$0xff] }
 0x5c3   : > { %v1075_v23 = vsel %vm1074_vm13, %v1070_v9, 0.0 }
 0x5c4   : > { %v1071_v38 = vld [vmem:[#allocation3 + $0x8] sm:$0xff] }
 0x5c5   : > { %v1076_v60 = vsel %vm1074_vm13, %v1071_v38, 0.0 }
 0x5c6   : > { %v1072_v32 = vld [vmem:[#allocation3 + $0x10] sm:$0xff]  ;;  %v1077_v47 = vadd.f32 %v1076_v60, %v1075_v23 }
 0x5c7   : > { %v1084_v62 = vsel %vm1074_vm13, %v1072_v32, 0.0 }
 0x5c8   : > { %v1073_v36 = vld [vmem:[#allocation3 + $0x18] sm:$0xff]  ;;  %v1078_v34 = vrot.slane %v1077_v47, 4 }
 0x5c9   : > { %v1085_v14 = vsel %vm1074_vm13, %v1073_v36, 0.0 }
 0x5ca   : > { %v1079_v58 = vadd.f32 %v1078_v34, %v1077_v47  ;;  %v1086_v28 = vadd.f32 %v1085_v14, %v1084_v62 }
 0x5cc   : > { %v1080_v63 = vrot.slane %v1079_v58, 2  ;;  %v1087_v52 = vrot.slane %v1086_v28, 4 }
 0x5ce   : > { %v1081_v42 = vadd.f32 %v1080_v63, %v1079_v58  ;;  %v1088_v35 = vadd.f32 %v1087_v52, %v1086_v28 }
 0x5d0   : > { %v1089_v27 = vrot.slane %v1088_v35, 2  ;;  %v1082_v40 = vrot.slane %v1081_v42, 1 }
 0x5d2   : > { %v1090_v45 = vadd.f32 %v1089_v27, %v1088_v35  ;;  %v1083_v8 = vadd.f32 %v1082_v40, %v1081_v42 }
 0x5d4   : > { %v1091_v2 = vrot.slane %v1090_v45, 1 }
 0x5d6   : > { %v1092_v39 = vadd.f32 %v1091_v2, %v1090_v45 }
 0x5d8   : > { %v1096_v10 = vsel %vm1095_vm14, %v1092_v39, %v1083_v8 }
 0x5d9   : > { %1099 = vst.msk [vmem:[%s176_s30] sm:$0x3] %vm1098_vm15, %v1096_v10 }
 0x5da   : > { %1415 = shalt.err (!%p1412_p7)
}
 0x5db   : > { %s1416_s18 = scalar_lea.hbm %s2194_s13, 32  ;;  %s1420_s25 = scalar_lea.hbm %s2249_s2, 192 }
 0x5dc   : > { %p1417_p9 = scmp.ne.s32.totalorder %s2194_s13, %s1416_s18  ;;  %p1421_p12 = scmp.lt.u32.totalorder %s2194_s13, %s2249_s2 }
 0x5dd   : > { %p1422_p13 = scmp.lt.u32.totalorder %s1420_s25, %s1416_s18  ;;  %p1424_p1 = scmp.lt.u32.totalorder %s1416_s18, %s2194_s13 }
 0x5de   : > { %p1418_p10 = pnand %p1417_p9, %p1566_p3 }
 0x5df   : > { %p1423_p0 = por %p1422_p13, %p1421_p12 }
 0x5e0   : > { %p1419_p11 = pneg %p1418_p10 }
 0x5e1   : > { %p1425_p2 = por %p1424_p1, %p1423_p0 }
 0x5e3   : > { %p1426_p4 = pnand %p1425_p2, %p1419_p11 }
 0x5e5   : > { %1429 = shalt.err (!%p1426_p4)
}
 0x5e6   : > { %1310 = dma.vmem_to_hbm [thread:$0]  (%p1566_p3), %s2196_s3, 32, %s2194_s13, %s1101_s12  }
 0x5e7 PF: > { %p1316_p5 = scmp.ge.s32.totalorder %s1496_s16, 2  ;;  %s1128_s29 = sand.u32 1, %s1468_s9  }
 0x5e8   : > { %s1129_s30 = scalar_lea.sflag [#allocation5], %s1128_s29 }
 0x5e9   : > { %p1313_p6 = pnand %p1316_p5, %p1575_p8 }
 0x5eb   : > { %1463 = dma.done.wait (!%p1313_p6), %s1129_s30, 32  }
 0x5ec   : > { %1465 = vsyncadd (!%p1313_p6), %s1129_s30, 4294967264  ;;  %s15_s16 = sadd.s32 1, %s1496_s16   ;;  %s2273_s9 = smov %s1472_s10 }
 0x5ed   : > { %p12_p7 = scmp.ge.s32.totalorder %s15_s16, 8   ;;  %s2274_s10 = smov %s1476_s11 }
 0x5ee   : > { %s2275_s11 = smov %s1584_s27  ;;  %s2276_s12 = smov %s1488_s14 }
 0x5ef   : > { %s2277_s13 = smov %s1492_s15  ;;  %s2278_s14 = smov %s2281_s19 }
 0x5f0   : > { %s2279_s15 = smov %s2285_s20  ;;  %14 = sbr.rel (!%p12_p7) target bundleno = 5 (0x5), region = 68 }
 0x5f7   :  { %1134 = vsyncpa [#allocation5], 1 }
 0x5f8   :  { %1136 = vsyncpa [#allocation5 + $0x1], 1 }

</bundles_post_ra>
